<compile_context>
chip_gen: v7x
topology: tpu7x:2x2x1
jax: 0.10.0
libtpu: 0.0.40
codegen_flags: <defaults>
</compile_context>

<pallas_src>
import functools

import jax
import jax.numpy as jnp
from jax.experimental import pallas as pl
from jax.experimental.pallas import tpu as pltpu

_NPAD = 128  # lane-dense width for the final (256 -> 1) layer


def _round_up(x, m):
    return ((x + m - 1) // m) * m


def _leaky_relu(x, slope=0.2):
    return jnp.where(x > 0, x, slope * x)


def discriminator_kernel(x_ref, w1_ref, b1_ref, w2_ref, b2_ref, w3_ref, b3_ref,
                         o_ref):
    # x:  (TB, D)    f32  (cast to bf16 here, on the VPU, under MXU slack)
    # w1: (D, 512)   bf16      b1: (1, 512)  f32
    # w2: (512, 256) bf16      b2: (1, 256)  f32
    # w3: (256, 128) bf16 (cols 1..127 are zero)   b3: (1, 128)  f32
    # o:  (TB, 128)  bf16 (only column 0 is meaningful)
    x = x_ref[...].astype(jnp.bfloat16)

    h1 = jnp.dot(x, w1_ref[...], preferred_element_type=jnp.float32)
    h1 = _leaky_relu(h1 + b1_ref[...])

    h2 = jnp.dot(h1.astype(jnp.bfloat16), w2_ref[...],
                 preferred_element_type=jnp.float32)
    h2 = _leaky_relu(h2 + b2_ref[...])

    h3 = jnp.dot(h2.astype(jnp.bfloat16), w3_ref[...],
                 preferred_element_type=jnp.float32) + b3_ref[...]

    # Sigmoid: exp + exact reciprocal both ride the EUP slot (off the MXU path).
    o_ref[...] = pl.reciprocal(1.0 + jnp.exp(-h3), approx=False).astype(o_ref.dtype)


def _pick_tb(B, D):
    """Batch tile: large enough to amortize ~0.35us/grid-step overhead, small
    enough that the double-buffered f32 (tb, D) x tile stays ~<= 8 MiB, and
    (for B > 8) small enough that the grid has >= 2 steps so both v7x
    TensorCores get work (harmless on v5e/v6e)."""
    cap = max(8, (((8 << 20) // (8 * D)) // 8) * 8)
    tb = min(512, _round_up(B, 8), cap)
    if B > 8:
        tb = min(tb, _round_up(-(-B // 2), 8))
    return tb


def prepare_params(params):
    """ONE-TIME conversion of f32 torch-layout params into kernel layout.

    Weights become bf16 (in_features, out_features); the final layer is
    zero-padded from width 1 to 128 lanes so the last matmul and the output
    store are lane-dense. Call this at init, not per forward call."""
    w1, b1, w2, b2, w3, b3 = params
    w1 = w1.astype(jnp.bfloat16)
    w2 = w2.astype(jnp.bfloat16)
    w3 = jnp.pad(w3, ((0, 0), (0, _NPAD - w3.shape[1]))).astype(jnp.bfloat16)
    b3 = jnp.pad(b3, ((0, 0), (0, _NPAD - b3.shape[1]))).astype(jnp.float32)
    return (w1, b1.astype(jnp.float32), w2, b2.astype(jnp.float32), w3, b3)


@functools.partial(jax.jit, static_argnames=("tb",))
def discriminator_forward(img, params, tb=None):
    """img: (B, C, H, W) float32; params from prepare_params().
    Returns (B, 1) float32 validity scores."""
    w1, b1, w2, b2, w3, b3 = params
    B = img.shape[0]
    x = img.reshape(B, -1)        # row-major flatten == torch .view(B, -1)
    D = x.shape[1]
    H1 = w1.shape[1]              # 512
    H2 = w2.shape[1]              # 256
    assert w3.shape == (H2, _NPAD) and b3.shape == (1, _NPAD), (
        "pass params through prepare_params() first")

    if tb is None:
        tb = _pick_tb(B, D)
    bp = _round_up(B, tb)
    if bp != B:
        x = jnp.pad(x, ((0, bp - B), (0, 0)))

    grid = (bp // tb,)
    const2 = lambda i: (0, 0)
    resident = pl.Buffered(1)     # grid-invariant blocks: single-buffered VMEM

    flops = 2 * bp * (D * H1 + H1 * H2 + H2 * _NPAD)
    bytes_accessed = (bp * D * 4                               # f32 x in
                      + (D * H1 + H1 * H2 + H2 * _NPAD) * 2    # bf16 weights
                      + (H1 + H2 + _NPAD) * 4                  # f32 biases
                      + bp * _NPAD * 2)                        # bf16 out

    # Explicit scoped-VMEM budget: double-buffered x/out tiles + resident
    # single-buffered weights + f32 intermediates, with 2x headroom.
    vmem_need = (2 * tb * D * 4 + 2 * tb * _NPAD * 2
                 + (D * H1 + H1 * H2 + H2 * _NPAD) * 2
                 + (H1 + H2 + _NPAD) * 4
                 + tb * (H1 + H2 + _NPAD) * 4)
    vmem_limit = int(min(64 << 20, max(32 << 20, 2 * vmem_need)))

    # TODO(synk): for very large img_area (bf16 w1 approaching the VMEM budget,
    # roughly D >= 8-12k on v7x and D >= 4-6k on v5e's 16 MiB default scope),
    # add a K-reduction grid axis over D with an f32 VMEM accumulator
    # (trailing "arbitrary" axis); unnecessary at these sizes.
    out = pl.pallas_call(
        discriminator_kernel,
        out_shape=jax.ShapeDtypeStruct((bp, _NPAD), jnp.bfloat16),
        grid=grid,
        in_specs=[
            pl.BlockSpec((tb, D), lambda i: (i, 0)),   # x tile (double-buffered)
            pl.BlockSpec((D, H1), const2, pipeline_mode=resident),
            pl.BlockSpec((1, H1), const2, pipeline_mode=resident),
            pl.BlockSpec((H1, H2), const2, pipeline_mode=resident),
            pl.BlockSpec((1, H2), const2, pipeline_mode=resident),
            pl.BlockSpec((H2, _NPAD), const2, pipeline_mode=resident),
            pl.BlockSpec((1, _NPAD), const2, pipeline_mode=resident),
        ],
        out_specs=pl.BlockSpec((tb, _NPAD), lambda i: (i, 0)),
        compiler_params=pltpu.CompilerParams(
            dimension_semantics=("parallel",),
            vmem_limit_bytes=vmem_limit),
        cost_estimate=pl.CostEstimate(
            flops=flops, transcendentals=bp * _NPAD,
            bytes_accessed=bytes_accessed),
    )(x, w1, b1, w2, b2, w3, b3)

    # Only the first B rows / lane 0 are real; cast back to f32 for parity
    # with the torch module's output dtype (tiny (B, 1) op).
    return out[:B, :1].astype(jnp.float32)


def init_params(key, img_area):
    """Deterministic f32 init mimicking torch.nn.Linear (uniform +-1/sqrt(fan_in))."""
    def linear(key, fan_in, fan_out):
        kw, kb = jax.random.split(key)
        bound = 1.0 / jnp.sqrt(jnp.float32(fan_in))
        w = jax.random.uniform(kw, (fan_in, fan_out), jnp.float32, -bound, bound)
        b = jax.random.uniform(kb, (1, fan_out), jnp.float32, -bound, bound)
        return w, b

    k1, k2, k3 = jax.random.split(key, 3)
    w1, b1 = linear(k1, img_area, 512)
    w2, b2 = linear(k2, 512, 256)
    w3, b3 = linear(k3, 256, 1)
    return (w1, b1, w2, b2, w3, b3)


def reference_forward(img, params):
    """Pure-JAX f32 reference for correctness checking."""
    w1, b1, w2, b2, w3, b3 = params
    x = img.reshape(img.shape[0], -1)
    h = _leaky_relu(x @ w1 + b1)
    h = _leaky_relu(h @ w2 + b2)
    return jax.nn.sigmoid(h @ w3 + b3)


if __name__ == "__main__":
    # Small shapes: batch=2, channels=4, img_size=16  => img_area = 1024.
    B, C, H, W = 2, 4, 16, 16
    key = jax.random.PRNGKey(0)
    k_img, k_params = jax.random.split(key)

    img = jax.random.normal(k_img, (B, C, H, W), dtype=jnp.float32)
    params_f32 = init_params(k_params, C * H * W)   # torch-like f32 params
    params = prepare_params(params_f32)             # one-time bf16/padded copy

    out = discriminator_forward(img, params)
    out = jax.block_until_ready(out)

    ref = reference_forward(img, params_f32)
    assert out.shape == (B, 1), out.shape
    # bf16 MXU inputs + bf16 output store (f32 accumulation) => loose tolerance.
    assert jnp.allclose(out, ref, atol=2e-2, rtol=2e-2), (out, ref)

    print("KERNEL_OK")
</pallas_src>

<mosaic_0001>
module attributes {stable_mosaic.version = 11 : i64} {
  func.func @discriminator_kernel(%arg0: i32, %arg1: memref<8x1024xf32, #tpu.memory_space<vmem>>, %arg2: memref<1024x512xbf16, #tpu.memory_space<vmem>>, %arg3: memref<1x512xf32, #tpu.memory_space<vmem>>, %arg4: memref<512x256xbf16, #tpu.memory_space<vmem>>, %arg5: memref<1x256xf32, #tpu.memory_space<vmem>>, %arg6: memref<256x128xbf16, #tpu.memory_space<vmem>>, %arg7: memref<1x128xf32, #tpu.memory_space<vmem>>, %arg8: memref<8x128xbf16, #tpu.memory_space<vmem>>) attributes {dimension_semantics = [#tpu.dimension_semantics<parallel>], iteration_bounds = array<i64: 1>, scalar_prefetch = 0 : i64, scratch_operands = 0 : i64, tpu.core_type = #tpu.core_type<tc>, window_params = [{transform_indices = @transform_0, window_bounds = array<i64: 8, 1024>}, {pipeline_mode = #tpu.pipeline_mode<synchronous>, transform_indices = @transform_1, window_bounds = array<i64: 1024, 512>}, {pipeline_mode = #tpu.pipeline_mode<synchronous>, transform_indices = @transform_2, window_bounds = array<i64: 1, 512>}, {pipeline_mode = #tpu.pipeline_mode<synchronous>, transform_indices = @transform_3, window_bounds = array<i64: 512, 256>}, {pipeline_mode = #tpu.pipeline_mode<synchronous>, transform_indices = @transform_4, window_bounds = array<i64: 1, 256>}, {pipeline_mode = #tpu.pipeline_mode<synchronous>, transform_indices = @transform_5, window_bounds = array<i64: 256, 128>}, {pipeline_mode = #tpu.pipeline_mode<synchronous>, transform_indices = @transform_6, window_bounds = array<i64: 1, 128>}, {transform_indices = @transform_7, window_bounds = array<i64: 8, 128>}]} {
    %c0 = arith.constant 0 : index
    %c0_0 = arith.constant 0 : index
    %0 = vector.load %arg1[%c0, %c0_0] : memref<8x1024xf32, #tpu.memory_space<vmem>>, vector<8x1024xf32>
    %1 = arith.truncf %0 : vector<8x1024xf32> to vector<8x1024xbf16>
    %c0_1 = arith.constant 0 : index
    %c0_2 = arith.constant 0 : index
    %2 = vector.load %arg2[%c0_1, %c0_2] : memref<1024x512xbf16, #tpu.memory_space<vmem>>, vector<1024x512xbf16>
    %cst = arith.constant dense<0.000000e+00> : vector<8x512xf32>
    %3 = tpu.matmul %1, %2, %cst {dimension_numbers = #tpu.dot_dimension_numbers<[1], [0], [0], [1], [0, 0, 1, 1], [], []>} : vector<8x1024xbf16>, vector<1024x512xbf16>, vector<8x512xf32> -> vector<8x512xf32>
    %c0_3 = arith.constant 0 : index
    %c0_4 = arith.constant 0 : index
    %4 = vector.load %arg3[%c0_3, %c0_4] : memref<1x512xf32, #tpu.memory_space<vmem>>, vector<1x512xf32>
    %5 = vector.broadcast %4 : vector<1x512xf32> to vector<8x512xf32>
    %6 = arith.addf %3, %5 : vector<8x512xf32>
    %cst_5 = arith.constant 0.000000e+00 : f32
    %7 = vector.broadcast %cst_5 : f32 to vector<8x512xf32>
    %8 = arith.cmpf ogt, %6, %7 : vector<8x512xf32>
    %cst_6 = arith.constant 2.000000e-01 : f32
    %9 = vector.broadcast %cst_6 : f32 to vector<8x512xf32>
    %10 = arith.mulf %9, %6 : vector<8x512xf32>
    %11 = arith.select %8, %6, %10 : vector<8x512xi1>, vector<8x512xf32>
    %12 = arith.truncf %11 : vector<8x512xf32> to vector<8x512xbf16>
    %c0_7 = arith.constant 0 : index
    %c0_8 = arith.constant 0 : index
    %13 = vector.load %arg4[%c0_7, %c0_8] : memref<512x256xbf16, #tpu.memory_space<vmem>>, vector<512x256xbf16>
    %cst_9 = arith.constant dense<0.000000e+00> : vector<8x256xf32>
    %14 = tpu.matmul %12, %13, %cst_9 {dimension_numbers = #tpu.dot_dimension_numbers<[1], [0], [0], [1], [0, 0, 1, 1], [], []>} : vector<8x512xbf16>, vector<512x256xbf16>, vector<8x256xf32> -> vector<8x256xf32>
    %c0_10 = arith.constant 0 : index
    %c0_11 = arith.constant 0 : index
    %15 = vector.load %arg5[%c0_10, %c0_11] : memref<1x256xf32, #tpu.memory_space<vmem>>, vector<1x256xf32>
    %16 = vector.broadcast %15 : vector<1x256xf32> to vector<8x256xf32>
    %17 = arith.addf %14, %16 : vector<8x256xf32>
    %cst_12 = arith.constant 0.000000e+00 : f32
    %18 = vector.broadcast %cst_12 : f32 to vector<8x256xf32>
    %19 = arith.cmpf ogt, %17, %18 : vector<8x256xf32>
    %cst_13 = arith.constant 2.000000e-01 : f32
    %20 = vector.broadcast %cst_13 : f32 to vector<8x256xf32>
    %21 = arith.mulf %20, %17 : vector<8x256xf32>
    %22 = arith.select %19, %17, %21 : vector<8x256xi1>, vector<8x256xf32>
    %23 = arith.truncf %22 : vector<8x256xf32> to vector<8x256xbf16>
    %c0_14 = arith.constant 0 : index
    %c0_15 = arith.constant 0 : index
    %24 = vector.load %arg6[%c0_14, %c0_15] : memref<256x128xbf16, #tpu.memory_space<vmem>>, vector<256x128xbf16>
    %cst_16 = arith.constant dense<0.000000e+00> : vector<8x128xf32>
    %25 = tpu.matmul %23, %24, %cst_16 {dimension_numbers = #tpu.dot_dimension_numbers<[1], [0], [0], [1], [0, 0, 1, 1], [], []>} : vector<8x256xbf16>, vector<256x128xbf16>, vector<8x128xf32> -> vector<8x128xf32>
    %c0_17 = arith.constant 0 : index
    %c0_18 = arith.constant 0 : index
    %26 = vector.load %arg7[%c0_17, %c0_18] : memref<1x128xf32, #tpu.memory_space<vmem>>, vector<1x128xf32>
    %27 = vector.broadcast %26 : vector<1x128xf32> to vector<8x128xf32>
    %28 = arith.addf %25, %27 : vector<8x128xf32>
    %cst_19 = arith.constant 0.000000e+00 : f32
    %29 = vector.broadcast %cst_19 : f32 to vector<8x128xf32>
    %30 = arith.subf %29, %28 : vector<8x128xf32>
    %31 = math.exp %30 : vector<8x128xf32>
    %cst_20 = arith.constant 1.000000e+00 : f32
    %32 = vector.broadcast %cst_20 : f32 to vector<8x128xf32>
    %33 = arith.addf %32, %31 : vector<8x128xf32>
    %34 = tpu.reciprocal %33 : vector<8x128xf32> -> vector<8x128xf32>
    %35 = arith.truncf %34 : vector<8x128xf32> to vector<8x128xbf16>
    %c0_21 = arith.constant 0 : index
    %c0_22 = arith.constant 0 : index
    %36 = vector.load %arg8[%c0_21, %c0_22] : memref<8x128xbf16, #tpu.memory_space<vmem>>, vector<8x128xbf16>
    tpu.vector_store %arg8[%c0_21, %c0_22], %35 {strides = array<i32>} : memref<8x128xbf16, #tpu.memory_space<vmem>>, vector<8x128xbf16>,
    return
  }
  func.func @transform_0(%arg0: i32) -> (i32, i32) {
    %c0_i32 = arith.constant 0 : i32
    %c0_i32_0 = arith.constant 0 : i32
    return %arg0, %c0_i32 : i32, i32
  }
  func.func @transform_1(%arg0: i32) -> (i32, i32) {
    %c0_i32 = arith.constant 0 : i32
    %c0_i32_0 = arith.constant 0 : i32
    %c0_i32_1 = arith.constant 0 : i32
    return %c0_i32, %c0_i32_0 : i32, i32
  }
  func.func @transform_2(%arg0: i32) -> (i32, i32) {
    %c0_i32 = arith.constant 0 : i32
    %c0_i32_0 = arith.constant 0 : i32
    %c0_i32_1 = arith.constant 0 : i32
    return %c0_i32, %c0_i32_0 : i32, i32
  }
  func.func @transform_3(%arg0: i32) -> (i32, i32) {
    %c0_i32 = arith.constant 0 : i32
    %c0_i32_0 = arith.constant 0 : i32
    %c0_i32_1 = arith.constant 0 : i32
    return %c0_i32, %c0_i32_0 : i32, i32
  }
  func.func @transform_4(%arg0: i32) -> (i32, i32) {
    %c0_i32 = arith.constant 0 : i32
    %c0_i32_0 = arith.constant 0 : i32
    %c0_i32_1 = arith.constant 0 : i32
    return %c0_i32, %c0_i32_0 : i32, i32
  }
  func.func @transform_5(%arg0: i32) -> (i32, i32) {
    %c0_i32 = arith.constant 0 : i32
    %c0_i32_0 = arith.constant 0 : i32
    %c0_i32_1 = arith.constant 0 : i32
    return %c0_i32, %c0_i32_0 : i32, i32
  }
  func.func @transform_6(%arg0: i32) -> (i32, i32) {
    %c0_i32 = arith.constant 0 : i32
    %c0_i32_0 = arith.constant 0 : i32
    %c0_i32_1 = arith.constant 0 : i32
    return %c0_i32, %c0_i32_0 : i32, i32
  }
  func.func @transform_7(%arg0: i32) -> (i32, i32) {
    %c0_i32 = arith.constant 0 : i32
    %c0_i32_0 = arith.constant 0 : i32
    return %arg0, %c0_i32 : i32, i32
  }
}

</mosaic_0001>

<bundles_post_ra>
// kernel: discriminator_forward.1
= control target key start
LH: loop header
LB: loop body
LE: loop exit
PB: predicated region body
PF: predicated region fallthrough
CT: control target
= control target key end

     0   :  { %12 = vsyncpa [#allocation3], 0  ;;  %s3798_s0 = inlined_call_operand.vmem [shape: f32[8,1024], index: 0, kind: input, shape index: {}]   ;;  %s3799_s1 = inlined_call_operand.hbm [shape: bf16[1024,512], index: 1, kind: input, shape index: {}]   ;;  %s3800_s2 = inlined_call_operand.vmem [shape: f32[1,512], index: 2, kind: input, shape index: {}]   ;;  %s3801_s3 = inlined_call_operand.hbm [shape: bf16[512,256], index: 3, kind: input, shape index: {}]   ;;  %s3802_s4 = inlined_call_operand.vmem [shape: f32[1,256], index: 4, kind: input, shape index: {}]   ;;  %s3803_s5 = inlined_call_operand.vmem [shape: bf16[256,128], index: 5, kind: input, shape index: {}]   ;;  %s3804_s6 = inlined_call_operand.vmem [shape: f32[1,128], index: 6, kind: input, shape index: {}]   ;;  %s3805_s7 = inlined_call_operand.vmem [shape: bf16[8,128], index: 7, kind: output, shape index: {}]  }
   0x1   :  { %13 = vsyncpa [#allocation5], 0  ;;  %s3592_s24 = smov [#allocation2]   ;;  %s3544_s28 = scalar_lea.hbm %s3799_s1, 32768 }
   0x2   :  { %s21_s25 = sshll.u32 %s3592_s24, 4  ;;  %p3545_p0 = scmp.ne.s32.totalorder %s3799_s1, %s3544_s28  ;;  %s22_s25 = int_to_ptr.vmem [resolvable:$true] %s21_s25 }
   0x3   :  { %p3548_p1 = scmp.lt.u32.totalorder %s3544_s28, %s3799_s1 }
   0x5   :  { %p3550_p2 = pnand %p3548_p1, %p3545_p0 }
   0x7   :  { %3553 = shalt.err (!%p3550_p2)
}
   0x8   :  { %s3554_s10 = scalar_lea.vmem %s22_s25, 32768  ;;  %p3559_p4 = scmp.lt.s32.totalorder %s22_s25, %s22_s25 }
   0x9   :  { %p3555_p3 = scmp.ne.s32.totalorder %s22_s25, %s3554_s10  ;;  %p3560_p5 = scmp.lt.s32.totalorder %s3554_s10, %s3554_s10 }
   0xb   :  { %p3561_p6 = por %p3560_p5, %p3559_p4 }
   0xd   :  { %p3562_p7 = pnand %p3561_p6, %p3555_p3 }
   0xf   :  { %3565 = shalt.err (!%p3562_p7)
}
  0x10   :  { %s3593_s11 = smov 256   ;;  %s3594_s12 = smov 16  }
  0x11   :  { %27 = dma.hbm_to_vmem [thread:$0]  %s3799_s1, 32768, %s22_s25, [#allocation3], %s3593_s11, %s3593_s11, %s3594_s12  }
  0x12   :  { %s3595_s15 = smov [#allocation4]   ;;  %s3566_s19 = scalar_lea.hbm %s3801_s3, 8192 }
  0x13   :  { %s35_s16 = sshll.u32 %s3595_s15, 4  ;;  %p3567_p8 = scmp.ne.s32.totalorder %s3801_s3, %s3566_s19  ;;  %s36_s16 = int_to_ptr.vmem [resolvable:$true] %s35_s16 }
  0x14   :  { %p3570_p9 = scmp.lt.u32.totalorder %s3566_s19, %s3801_s3 }
  0x16   :  { %p3572_p10 = pnand %p3570_p9, %p3567_p8 }
  0x18   :  { %3575 = shalt.err (!%p3572_p10)
}
  0x19   :  { %s3576_s24 = scalar_lea.vmem %s36_s16, 8192  ;;  %p3581_p12 = scmp.lt.s32.totalorder %s36_s16, %s36_s16 }
  0x1a   :  { %p3577_p11 = scmp.ne.s32.totalorder %s36_s16, %s3576_s24  ;;  %p3582_p13 = scmp.lt.s32.totalorder %s3576_s24, %s3576_s24 }
  0x1c   :  { %p3583_p0 = por %p3582_p13, %p3581_p12 }
  0x1e   :  { %p3584_p1 = pnand %p3583_p0, %p3577_p11 }
  0x20   :  { %3587 = shalt.err (!%p3584_p1)
}
  0x21   :  { %s3596_s1 = smov 128   ;;  %s3597_s25 = smov 8  }
  0x22   :  { %41 = dma.hbm_to_vmem [thread:$0]  %s3801_s3, 8192, %s36_s16, [#allocation5], %s3596_s1, %s3596_s1, %s3597_s25  }
  0x23   :  { %3588 = dma.done.wait [#allocation3], 32768  }
  0x24   :  { %3589 = vsyncadd [#allocation3], 4294934528 }
  0x25   :  { %3590 = dma.done.wait [#allocation5], 8192  }
  0x26   :  { %3591 = vsyncadd [#allocation5], 4294959104  ;;  %v3044_v0 = vld [vmem:[#allocation2 + $0x4] ss:$16 sps:$4 sm:$0xff]   ;;  %v3048_v2 = vld [vmem:[#allocation2] ss:$16 sps:$4 sm:$0xff]  }
  0x27   :  { %v3046_v1 = vld [vmem:[#allocation2 + $0x204] ss:$16 sps:$4 sm:$0xff]   ;;  %1629 = vmatprep.subr.bf16.mxu1 %v3044_v0  ;;  %v3049_v3 = vld [vmem:[#allocation2 + $0x200] ss:$16 sps:$4 sm:$0xff]   ;;  %v56_v46 = vld [vmem:[%s3798_s0 + $0x8] sm:$0xff] }
  0x28   :  { %1670 = vmatprep.subr.bf16.mxu0 %v3046_v1  ;;  %v3050_v4 = vld [vmem:[#allocation2 + $0x24] ss:$16 sps:$4 sm:$0xff]   ;;  %1630 = vmatpush1.bf16.msra.mxu1 %v3048_v2  ;;  %v3054_v6 = vld [vmem:[#allocation2 + $0x20] ss:$16 sps:$4 sm:$0xff]   ;;  %v3665_v48 = vpack.c.bf16 %v56_v46, %v56_v46  ;;  %v58_v49 = vld [vmem:[%s3798_s0 + $0x18] sm:$0xff] }
  0x29   :  { %1671 = vmatpush1.bf16.msra.mxu0 %v3049_v3  ;;  %v3052_v5 = vld [vmem:[#allocation2 + $0x224] ss:$16 sps:$4 sm:$0xff]   ;;  %1631 = vmatprep.subr.bf16.mxu1 %v3050_v4  ;;  %v3055_v7 = vld [vmem:[#allocation2 + $0x220] ss:$16 sps:$4 sm:$0xff]   ;;  %v3670_v52 = vpack.c.bf16 %v58_v49, %v58_v49  ;;  %v3197_v49 = vld [vmem:[#allocation2 + $0x128] ss:$16 sps:$4 sm:$0xff]  }
  0x2a   :  { %1672 = vmatprep.subr.bf16.mxu0 %v3052_v5  ;;  %v3056_v8 = vld [vmem:[#allocation2 + $0x44] ss:$16 sps:$4 sm:$0xff]   ;;  %v3060_v10 = vld [vmem:[#allocation2 + $0x40] ss:$16 sps:$4 sm:$0xff]   ;;  %1661 = vmatprep.mubr.bf16.mxu1 %v3665_v48 }
  0x2b   :  { %v3058_v9 = vld [vmem:[#allocation2 + $0x244] ss:$16 sps:$4 sm:$0xff]   ;;  %v3061_v11 = vld [vmem:[#allocation2 + $0x240] ss:$16 sps:$4 sm:$0xff]   ;;  %1702 = vmatprep.mubr.bf16.mxu0 %v3670_v52 }
  0x2c   :  { %1632 = vmatpush1.bf16.msra.mxu1 %v3054_v6  ;;  %v3062_v12 = vld [vmem:[#allocation2 + $0x64] ss:$16 sps:$4 sm:$0xff]   ;;  %v3066_v14 = vld [vmem:[#allocation2 + $0x60] ss:$16 sps:$4 sm:$0xff]  }
  0x2d   :  { %1673 = vmatpush1.bf16.msra.mxu0 %v3055_v7  ;;  %1633 = vmatprep.subr.bf16.mxu1 %v3056_v8  ;;  %v3064_v13 = vld [vmem:[#allocation2 + $0x264] ss:$16 sps:$4 sm:$0xff]   ;;  %v3067_v15 = vld [vmem:[#allocation2 + $0x260] ss:$16 sps:$4 sm:$0xff]   ;;  %v3145_v7 = vld [vmem:[#allocation2 + $0xc] ss:$16 sps:$4 sm:$0xff]  }
  0x2e   :  { %1674 = vmatprep.subr.bf16.mxu0 %v3058_v9  ;;  %v3068_v16 = vld [vmem:[#allocation2 + $0x84] ss:$16 sps:$4 sm:$0xff]   ;;  %v3072_v18 = vld [vmem:[#allocation2 + $0x80] ss:$16 sps:$4 sm:$0xff]  }
  0x2f   :  { %v3070_v17 = vld [vmem:[#allocation2 + $0x284] ss:$16 sps:$4 sm:$0xff]   ;;  %v3073_v19 = vld [vmem:[#allocation2 + $0x280] ss:$16 sps:$4 sm:$0xff]  }
  0x30   :  { %1634 = vmatpush1.bf16.msra.mxu1 %v3060_v10  ;;  %v3074_v20 = vld [vmem:[#allocation2 + $0xa4] ss:$16 sps:$4 sm:$0xff]   ;;  %v3078_v22 = vld [vmem:[#allocation2 + $0xa0] ss:$16 sps:$4 sm:$0xff]   ;;  %v3143_v10 = vld [vmem:[#allocation2 + $0x8] ss:$16 sps:$4 sm:$0xff]  }
  0x31   :  { %1675 = vmatpush1.bf16.msra.mxu0 %v3061_v11  ;;  %1635 = vmatprep.subr.bf16.mxu1 %v3062_v12  ;;  %v3076_v21 = vld [vmem:[#allocation2 + $0x2a4] ss:$16 sps:$4 sm:$0xff]   ;;  %v3079_v23 = vld [vmem:[#allocation2 + $0x2a0] ss:$16 sps:$4 sm:$0xff]  }
  0x32   :  { %1676 = vmatprep.subr.bf16.mxu0 %v3064_v13  ;;  %v3080_v24 = vld [vmem:[#allocation2 + $0xc4] ss:$16 sps:$4 sm:$0xff]   ;;  %v3084_v26 = vld [vmem:[#allocation2 + $0xc0] ss:$16 sps:$4 sm:$0xff]   ;;  %v3151_v13 = vld [vmem:[#allocation2 + $0x2c] ss:$16 sps:$4 sm:$0xff]  }
  0x33   :  { %v3082_v25 = vld [vmem:[#allocation2 + $0x2c4] ss:$16 sps:$4 sm:$0xff]   ;;  %v3085_v27 = vld [vmem:[#allocation2 + $0x2c0] ss:$16 sps:$4 sm:$0xff]  }
  0x34   :  { %1636 = vmatpush1.bf16.msra.mxu1 %v3066_v14  ;;  %v3086_v28 = vld [vmem:[#allocation2 + $0xe4] ss:$16 sps:$4 sm:$0xff]   ;;  %v3090_v30 = vld [vmem:[#allocation2 + $0xe0] ss:$16 sps:$4 sm:$0xff]  }
  0x35   :  { %1677 = vmatpush1.bf16.msra.mxu0 %v3067_v15  ;;  %1637 = vmatprep.subr.bf16.mxu1 %v3068_v16  ;;  %v3088_v29 = vld [vmem:[#allocation2 + $0x2e4] ss:$16 sps:$4 sm:$0xff]   ;;  %v3091_v31 = vld [vmem:[#allocation2 + $0x2e0] ss:$16 sps:$4 sm:$0xff]   ;;  %v3149_v15 = vld [vmem:[#allocation2 + $0x28] ss:$16 sps:$4 sm:$0xff]  }
  0x36   :  { %1678 = vmatprep.subr.bf16.mxu0 %v3070_v17  ;;  %v3092_v32 = vld [vmem:[#allocation2 + $0x104] ss:$16 sps:$4 sm:$0xff]   ;;  %v3096_v34 = vld [vmem:[#allocation2 + $0x100] ss:$16 sps:$4 sm:$0xff]   ;;  %v3157_v17 = vld [vmem:[#allocation2 + $0x4c] ss:$16 sps:$4 sm:$0xff]  }
  0x37   :  { %v3094_v33 = vld [vmem:[#allocation2 + $0x304] ss:$16 sps:$4 sm:$0xff]   ;;  %v3097_v35 = vld [vmem:[#allocation2 + $0x300] ss:$16 sps:$4 sm:$0xff]  }
  0x38   :  { %1638 = vmatpush1.bf16.msra.mxu1 %v3072_v18  ;;  %v3098_v36 = vld [vmem:[#allocation2 + $0x124] ss:$16 sps:$4 sm:$0xff]   ;;  %v3102_v38 = vld [vmem:[#allocation2 + $0x120] ss:$16 sps:$4 sm:$0xff]  }
  0x39   :  { %1679 = vmatpush1.bf16.msra.mxu0 %v3073_v19  ;;  %1639 = vmatprep.subr.bf16.mxu1 %v3074_v20  ;;  %v3100_v37 = vld [vmem:[#allocation2 + $0x324] ss:$16 sps:$4 sm:$0xff]   ;;  %v3103_v39 = vld [vmem:[#allocation2 + $0x320] ss:$16 sps:$4 sm:$0xff]   ;;  %v3155_v19 = vld [vmem:[#allocation2 + $0x48] ss:$16 sps:$4 sm:$0xff]  }
  0x3a   :  { %1680 = vmatprep.subr.bf16.mxu0 %v3076_v21  ;;  %v3104_v40 = vld [vmem:[#allocation2 + $0x144] ss:$16 sps:$4 sm:$0xff]   ;;  %v3108_v42 = vld [vmem:[#allocation2 + $0x140] ss:$16 sps:$4 sm:$0xff]   ;;  %v3163_v21 = vld [vmem:[#allocation2 + $0x6c] ss:$16 sps:$4 sm:$0xff]  }
  0x3b   :  { %v3106_v41 = vld [vmem:[#allocation2 + $0x344] ss:$16 sps:$4 sm:$0xff]   ;;  %v3109_v43 = vld [vmem:[#allocation2 + $0x340] ss:$16 sps:$4 sm:$0xff]  }
  0x3c   :  { %1640 = vmatpush1.bf16.msra.mxu1 %v3078_v22  ;;  %v3110_v44 = vld [vmem:[#allocation2 + $0x164] ss:$16 sps:$4 sm:$0xff]   ;;  %v3114_v47 = vld [vmem:[#allocation2 + $0x160] ss:$16 sps:$4 sm:$0xff]  }
  0x3d   :  { %1681 = vmatpush1.bf16.msra.mxu0 %v3079_v23  ;;  %1641 = vmatprep.subr.bf16.mxu1 %v3080_v24  ;;  %v3112_v45 = vld [vmem:[#allocation2 + $0x364] ss:$16 sps:$4 sm:$0xff]   ;;  %v3115_v50 = vld [vmem:[#allocation2 + $0x360] ss:$16 sps:$4 sm:$0xff]   ;;  %v3161_v23 = vld [vmem:[#allocation2 + $0x68] ss:$16 sps:$4 sm:$0xff]  }
  0x3e   :  { %1682 = vmatprep.subr.bf16.mxu0 %v3082_v25  ;;  %v3116_v51 = vld [vmem:[#allocation2 + $0x184] ss:$16 sps:$4 sm:$0xff]   ;;  %v3120_v54 = vld [vmem:[#allocation2 + $0x180] ss:$16 sps:$4 sm:$0xff]   ;;  %v3169_v25 = vld [vmem:[#allocation2 + $0x8c] ss:$16 sps:$4 sm:$0xff]  }
  0x3f   :  { %v3118_v53 = vld [vmem:[#allocation2 + $0x384] ss:$16 sps:$4 sm:$0xff]   ;;  %v3121_v55 = vld [vmem:[#allocation2 + $0x380] ss:$16 sps:$4 sm:$0xff]  }
  0x40   :  { %1642 = vmatpush1.bf16.msra.mxu1 %v3084_v26  ;;  %v3122_v56 = vld [vmem:[#allocation2 + $0x1a4] ss:$16 sps:$4 sm:$0xff]   ;;  %v3126_v58 = vld [vmem:[#allocation2 + $0x1a0] ss:$16 sps:$4 sm:$0xff]  }
  0x41   :  { %1683 = vmatpush1.bf16.msra.mxu0 %v3085_v27  ;;  %1643 = vmatprep.subr.bf16.mxu1 %v3086_v28  ;;  %v3124_v57 = vld [vmem:[#allocation2 + $0x3a4] ss:$16 sps:$4 sm:$0xff]   ;;  %v3127_v59 = vld [vmem:[#allocation2 + $0x3a0] ss:$16 sps:$4 sm:$0xff]   ;;  %v3167_v27 = vld [vmem:[#allocation2 + $0x88] ss:$16 sps:$4 sm:$0xff]  }
  0x42   :  { %1684 = vmatprep.subr.bf16.mxu0 %v3088_v29  ;;  %v3128_v60 = vld [vmem:[#allocation2 + $0x1c4] ss:$16 sps:$4 sm:$0xff]   ;;  %v3132_v62 = vld [vmem:[#allocation2 + $0x1c0] ss:$16 sps:$4 sm:$0xff]   ;;  %v3175_v29 = vld [vmem:[#allocation2 + $0xac] ss:$16 sps:$4 sm:$0xff]  }
  0x43   :  { %v3130_v61 = vld [vmem:[#allocation2 + $0x3c4] ss:$16 sps:$4 sm:$0xff]   ;;  %v3133_v63 = vld [vmem:[#allocation2 + $0x3c0] ss:$16 sps:$4 sm:$0xff]  }
  0x44   :  { %1644 = vmatpush1.bf16.msra.mxu1 %v3090_v30  ;;  %v3134_v0 = vld [vmem:[#allocation2 + $0x1e4] ss:$16 sps:$4 sm:$0xff]   ;;  %v3138_v2 = vld [vmem:[#allocation2 + $0x1e0] ss:$16 sps:$4 sm:$0xff]  }
  0x45   :  { %1685 = vmatpush1.bf16.msra.mxu0 %v3091_v31  ;;  %1645 = vmatprep.subr.bf16.mxu1 %v3092_v32  ;;  %v3136_v1 = vld [vmem:[#allocation2 + $0x3e4] ss:$16 sps:$4 sm:$0xff]   ;;  %v3139_v3 = vld [vmem:[#allocation2 + $0x3e0] ss:$16 sps:$4 sm:$0xff]   ;;  %v3173_v31 = vld [vmem:[#allocation2 + $0xa8] ss:$16 sps:$4 sm:$0xff]  }
  0x46   :  { %1686 = vmatprep.subr.bf16.mxu0 %v3094_v33  ;;  %v55_v4 = vld [vmem:[%s3798_s0] sm:$0xff]  ;;  %v57_v6 = vld [vmem:[%s3798_s0 + $0x10] sm:$0xff]  ;;  %v3181_v33 = vld [vmem:[#allocation2 + $0xcc] ss:$16 sps:$4 sm:$0xff]  }
  0x47   :  { %v3142_v5 = vld [vmem:[#allocation2 + $0x404] ss:$16 sps:$4 sm:$0xff]   ;;  %v3680_v8 = vpack.c.bf16 %v55_v4, %v55_v4  ;;  %v3140_v9 = vld [vmem:[#allocation2 + $0x400] ss:$16 sps:$4 sm:$0xff]   ;;  %v3682_v11 = vpack.c.bf16 %v57_v6, %v57_v6  ;;  %v3229_v4 = vld [vmem:[#allocation2 + $0x1cc] ss:$16 sps:$4 sm:$0xff]  }
  0x48   :  { %1646 = vmatpush1.bf16.msra.mxu1 %v3096_v34  ;;  %v3148_v12 = vld [vmem:[#allocation2 + $0x424] ss:$16 sps:$4 sm:$0xff]   ;;  %v3146_v14 = vld [vmem:[#allocation2 + $0x420] ss:$16 sps:$4 sm:$0xff]   ;;  %v60_v34 = vld [vmem:[%s3798_s0 + $0x28] sm:$0xff] }
  0x49   :  { %1687 = vmatpush1.bf16.msra.mxu0 %v3097_v35  ;;  %1647 = vmatprep.subr.bf16.mxu1 %v3098_v36  ;;  %v3154_v16 = vld [vmem:[#allocation2 + $0x444] ss:$16 sps:$4 sm:$0xff]   ;;  %v3152_v18 = vld [vmem:[#allocation2 + $0x440] ss:$16 sps:$4 sm:$0xff]   ;;  %v3690_v36 = vpack.c.bf16 %v60_v34, %v60_v34  ;;  %v3227_v6 = vld [vmem:[#allocation2 + $0x1c8] ss:$16 sps:$4 sm:$0xff]  }
  0x4a   :  { %1688 = vmatprep.subr.bf16.mxu0 %v3100_v37  ;;  %v3160_v20 = vld [vmem:[#allocation2 + $0x464] ss:$16 sps:$4 sm:$0xff]   ;;  %v3158_v22 = vld [vmem:[#allocation2 + $0x460] ss:$16 sps:$4 sm:$0xff]   ;;  %v3179_v37 = vld [vmem:[#allocation2 + $0xc8] ss:$16 sps:$4 sm:$0xff]  }
  0x4b   :  { %v3166_v24 = vld [vmem:[#allocation2 + $0x484] ss:$16 sps:$4 sm:$0xff]   ;;  %v3164_v26 = vld [vmem:[#allocation2 + $0x480] ss:$16 sps:$4 sm:$0xff]  }
  0x4c   :  { %1648 = vmatpush1.bf16.msra.mxu1 %v3102_v38  ;;  %v3172_v28 = vld [vmem:[#allocation2 + $0x4a4] ss:$16 sps:$4 sm:$0xff]   ;;  %v3170_v30 = vld [vmem:[#allocation2 + $0x4a0] ss:$16 sps:$4 sm:$0xff]  }
  0x4d   :  { %1689 = vmatpush1.bf16.msra.mxu0 %v3103_v39  ;;  %1649 = vmatprep.subr.bf16.mxu1 %v3104_v40  ;;  %v3178_v32 = vld [vmem:[#allocation2 + $0x4c4] ss:$16 sps:$4 sm:$0xff]   ;;  %v3176_v35 = vld [vmem:[#allocation2 + $0x4c0] ss:$16 sps:$4 sm:$0xff]   ;;  %v3187_v39 = vld [vmem:[#allocation2 + $0xec] ss:$16 sps:$4 sm:$0xff]  }
  0x4e   :  { %1690 = vmatprep.subr.bf16.mxu0 %v3106_v41  ;;  %v3184_v38 = vld [vmem:[#allocation2 + $0x4e4] ss:$16 sps:$4 sm:$0xff]   ;;  %v3182_v40 = vld [vmem:[#allocation2 + $0x4e0] ss:$16 sps:$4 sm:$0xff]   ;;  %v3185_v41 = vld [vmem:[#allocation2 + $0xe8] ss:$16 sps:$4 sm:$0xff]  }
  0x4f   :  { %v3196_v46 = vld [vmem:[#allocation2 + $0x524] ss:$16 sps:$4 sm:$0xff]   ;;  %v3260_v34 = vld [vmem:[#allocation2 + $0x680] ss:$16 sps:$4 sm:$0xff]  }
  0x50   :  { %1650 = vmatpush1.bf16.msra.mxu1 %v3108_v42  ;;  %v3190_v42 = vld [vmem:[#allocation2 + $0x504] ss:$16 sps:$4 sm:$0xff]  }
  0x51   :  { %1691 = vmatpush1.bf16.msra.mxu0 %v3109_v43  ;;  %1651 = vmatprep.subr.bf16.mxu1 %v3110_v44  ;;  %v3193_v43 = vld [vmem:[#allocation2 + $0x10c] ss:$16 sps:$4 sm:$0xff]   ;;  %v3188_v44 = vld [vmem:[#allocation2 + $0x500] ss:$16 sps:$4 sm:$0xff]  }
  0x52   :  { %1692 = vmatprep.subr.bf16.mxu0 %v3112_v45  ;;  %v3191_v45 = vld [vmem:[#allocation2 + $0x108] ss:$16 sps:$4 sm:$0xff]  }
  0x54   :  { %1652 = vmatpush1.bf16.msra.mxu1 %v3114_v47  ;;  %v3199_v47 = vld [vmem:[#allocation2 + $0x12c] ss:$16 sps:$4 sm:$0xff]  }
  0x55   :  { %1693 = vmatpush1.bf16.msra.mxu0 %v3115_v50  ;;  %1653 = vmatprep.subr.bf16.mxu1 %v3116_v51  ;;  %v3202_v50 = vld [vmem:[#allocation2 + $0x544] ss:$16 sps:$4 sm:$0xff]   ;;  %v3205_v51 = vld [vmem:[#allocation2 + $0x14c] ss:$16 sps:$4 sm:$0xff]  }
  0x56   :  { %1694 = vmatprep.subr.bf16.mxu0 %v3118_v53  ;;  %v3200_v53 = vld [vmem:[#allocation2 + $0x540] ss:$16 sps:$4 sm:$0xff]  }
  0x58   :  { %1654 = vmatpush1.bf16.msra.mxu1 %v3120_v54  ;;  %v3203_v54 = vld [vmem:[#allocation2 + $0x148] ss:$16 sps:$4 sm:$0xff]  }
  0x59   :  { %1695 = vmatpush1.bf16.msra.mxu0 %v3121_v55  ;;  %1655 = vmatprep.subr.bf16.mxu1 %v3122_v56  ;;  %v3208_v55 = vld [vmem:[#allocation2 + $0x564] ss:$16 sps:$4 sm:$0xff]   ;;  %v3211_v56 = vld [vmem:[#allocation2 + $0x16c] ss:$16 sps:$4 sm:$0xff]  }
  0x5a   :  { %1696 = vmatprep.subr.bf16.mxu0 %v3124_v57  ;;  %v3206_v57 = vld [vmem:[#allocation2 + $0x560] ss:$16 sps:$4 sm:$0xff]  }
  0x5c   :  { %1656 = vmatpush1.bf16.msra.mxu1 %v3126_v58  ;;  %v3209_v58 = vld [vmem:[#allocation2 + $0x168] ss:$16 sps:$4 sm:$0xff]  }
  0x5d   :  { %1697 = vmatpush1.bf16.msra.mxu0 %v3127_v59  ;;  %1657 = vmatprep.subr.bf16.mxu1 %v3128_v60  ;;  %v3214_v59 = vld [vmem:[#allocation2 + $0x584] ss:$16 sps:$4 sm:$0xff]   ;;  %v3217_v60 = vld [vmem:[#allocation2 + $0x18c] ss:$16 sps:$4 sm:$0xff]  }
  0x5e   :  { %1698 = vmatprep.subr.bf16.mxu0 %v3130_v61  ;;  %v3212_v61 = vld [vmem:[#allocation2 + $0x580] ss:$16 sps:$4 sm:$0xff]  }
  0x60   :  { %1658 = vmatpush1.bf16.msra.mxu1 %v3132_v62  ;;  %v3215_v62 = vld [vmem:[#allocation2 + $0x188] ss:$16 sps:$4 sm:$0xff]  }
  0x61   :  { %1699 = vmatpush1.bf16.msra.mxu0 %v3133_v63  ;;  %1659 = vmatprep.subr.bf16.mxu1 %v3134_v0  ;;  %v3220_v63 = vld [vmem:[#allocation2 + $0x5a4] ss:$16 sps:$4 sm:$0xff]   ;;  %v3223_v0 = vld [vmem:[#allocation2 + $0x1ac] ss:$16 sps:$4 sm:$0xff]  }
  0x62   :  { %1700 = vmatprep.subr.bf16.mxu0 %v3136_v1  ;;  %v3218_v1 = vld [vmem:[#allocation2 + $0x5a0] ss:$16 sps:$4 sm:$0xff]  }
  0x64   :  { %1660 = vmatpush1.bf16.msra.mxu1 %v3138_v2  ;;  %v3221_v2 = vld [vmem:[#allocation2 + $0x1a8] ss:$16 sps:$4 sm:$0xff]  }
  0x65   :  { %1701 = vmatpush1.bf16.msra.mxu0 %v3139_v3  ;;  %1793 = vmatprep.subr.bf16.mxu1 %v3145_v7  ;;  %v3226_v3 = vld [vmem:[#allocation2 + $0x5c4] ss:$16 sps:$4 sm:$0xff]  }
  0x66   :  { %1711 = vmatprep.subr.bf16.mxu0 %v3142_v5  ;;  %v3224_v5 = vld [vmem:[#allocation2 + $0x5c0] ss:$16 sps:$4 sm:$0xff]   ;;  %v3232_v7 = vld [vmem:[#allocation2 + $0x5e4] ss:$16 sps:$4 sm:$0xff]  }
  0x67   :  { %1662 = vmatmul.mubr.bf16.vlgmr.msra.gmra.mrb[0].mxu1 %v3680_v8 }
  0x68   :  { %1703 = vmatmul.mubr.bf16.vlgmr.msra.gmra.mrb[0].mxu0 %v3682_v11  ;;  %1794 = vmatpush1.bf16.msra.mxu1 %v3143_v10  ;;  %v3230_v10 = vld [vmem:[#allocation2 + $0x5e0] ss:$16 sps:$4 sm:$0xff]  }
  0x69   :  { %1712 = vmatpush1.bf16.msra.mxu0 %v3140_v9  ;;  %1795 = vmatprep.subr.bf16.mxu1 %v3151_v13  ;;  %v3235_v9 = vld [vmem:[#allocation2 + $0x1ec] ss:$16 sps:$4 sm:$0xff]   ;;  %v59_v13 = vld [vmem:[%s3798_s0 + $0x20] sm:$0xff] }
  0x6a   :  { %1713 = vmatprep.subr.bf16.mxu0 %v3148_v12  ;;  %1825 = vmatprep.mubr.bf16.mxu1 %v3665_v48  ;;  %v3194_v48 = vld [vmem:[#allocation2 + $0x520] ss:$16 sps:$4 sm:$0xff]   ;;  %v3233_v12 = vld [vmem:[#allocation2 + $0x1e8] ss:$16 sps:$4 sm:$0xff]  }
  0x6b   :  { %1743 = vmatprep.mubr.bf16.mxu0 %v3690_v36 }
  0x6c   :  { %1796 = vmatpush1.bf16.msra.mxu1 %v3149_v15  ;;  %v3241_v15 = vld [vmem:[#allocation2 + $0x20c] ss:$16 sps:$4 sm:$0xff]  }
  0x6d   :  { %1714 = vmatpush1.bf16.msra.mxu0 %v3146_v14  ;;  %1797 = vmatprep.subr.bf16.mxu1 %v3157_v17  ;;  %v3238_v14 = vld [vmem:[#allocation2 + $0x604] ss:$16 sps:$4 sm:$0xff]   ;;  %v3236_v17 = vld [vmem:[#allocation2 + $0x600] ss:$16 sps:$4 sm:$0xff]  }
  0x6e   :  { %1715 = vmatprep.subr.bf16.mxu0 %v3154_v16  ;;  %v3696_v16 = vpack.c.bf16 %v59_v13, %v59_v13  ;;  %v3320_v13 = vld [vmem:[#allocation2 + $0x7c0] ss:$16 sps:$4 sm:$0xff]  }
  0x70   :  { %1798 = vmatpush1.bf16.msra.mxu1 %v3155_v19  ;;  %v3244_v19 = vld [vmem:[#allocation2 + $0x624] ss:$16 sps:$4 sm:$0xff]  }
  0x71   :  { %1716 = vmatpush1.bf16.msra.mxu0 %v3152_v18  ;;  %1799 = vmatprep.subr.bf16.mxu1 %v3163_v21  ;;  %v3239_v18 = vld [vmem:[#allocation2 + $0x208] ss:$16 sps:$4 sm:$0xff]  }
  0x72   :  { %1717 = vmatprep.subr.bf16.mxu0 %v3160_v20  ;;  %v3247_v20 = vld [vmem:[#allocation2 + $0x22c] ss:$16 sps:$4 sm:$0xff]  }
  0x73   :  { %v62_v21 = vld [vmem:[%s3798_s0 + $0x38] sm:$0xff] }
  0x74   :  { %1800 = vmatpush1.bf16.msra.mxu1 %v3161_v23  ;;  %v3245_v23 = vld [vmem:[#allocation2 + $0x228] ss:$16 sps:$4 sm:$0xff]  }
  0x75   :  { %1718 = vmatpush1.bf16.msra.mxu0 %v3158_v22  ;;  %1801 = vmatprep.subr.bf16.mxu1 %v3169_v25  ;;  %v3242_v22 = vld [vmem:[#allocation2 + $0x620] ss:$16 sps:$4 sm:$0xff]   ;;  %v3250_v25 = vld [vmem:[#allocation2 + $0x644] ss:$16 sps:$4 sm:$0xff]  }
  0x76   :  { %1719 = vmatprep.subr.bf16.mxu0 %v3166_v24  ;;  %v3703_v24 = vpack.c.bf16 %v62_v21, %v62_v21  ;;  %v3334_v21 = vld [vmem:[#allocation2 + $0x40c] ss:$16 sps:$4 sm:$0xff]  }
  0x78   :  { %1802 = vmatpush1.bf16.msra.mxu1 %v3167_v27  ;;  %v3248_v27 = vld [vmem:[#allocation2 + $0x640] ss:$16 sps:$4 sm:$0xff]  }
  0x79   :  { %1720 = vmatpush1.bf16.msra.mxu0 %v3164_v26  ;;  %1803 = vmatprep.subr.bf16.mxu1 %v3175_v29  ;;  %v3253_v26 = vld [vmem:[#allocation2 + $0x24c] ss:$16 sps:$4 sm:$0xff]   ;;  %v3256_v29 = vld [vmem:[#allocation2 + $0x664] ss:$16 sps:$4 sm:$0xff]  }
  0x7a   :  { %1721 = vmatprep.subr.bf16.mxu0 %v3172_v28  ;;  %v3251_v28 = vld [vmem:[#allocation2 + $0x248] ss:$16 sps:$4 sm:$0xff]  }
  0x7c   :  { %1804 = vmatpush1.bf16.msra.mxu1 %v3173_v31  ;;  %v3257_v31 = vld [vmem:[#allocation2 + $0x268] ss:$16 sps:$4 sm:$0xff]  }
  0x7d   :  { %1722 = vmatpush1.bf16.msra.mxu0 %v3170_v30  ;;  %1805 = vmatprep.subr.bf16.mxu1 %v3181_v33  ;;  %v3254_v30 = vld [vmem:[#allocation2 + $0x660] ss:$16 sps:$4 sm:$0xff]   ;;  %v3265_v33 = vld [vmem:[#allocation2 + $0x28c] ss:$16 sps:$4 sm:$0xff]  }
  0x7e   :  { %1723 = vmatprep.subr.bf16.mxu0 %v3178_v32  ;;  %v3262_v32 = vld [vmem:[#allocation2 + $0x684] ss:$16 sps:$4 sm:$0xff]  }
  0x80   :  { %1806 = vmatpush1.bf16.msra.mxu1 %v3179_v37  ;;  %v3271_v37 = vld [vmem:[#allocation2 + $0x2ac] ss:$16 sps:$4 sm:$0xff]  }
  0x81   :  { %1724 = vmatpush1.bf16.msra.mxu0 %v3176_v35  ;;  %1807 = vmatprep.subr.bf16.mxu1 %v3187_v39  ;;  %v3263_v35 = vld [vmem:[#allocation2 + $0x288] ss:$16 sps:$4 sm:$0xff]  }
  0x82   :  { %1725 = vmatprep.subr.bf16.mxu0 %v3184_v38  ;;  %v3266_v38 = vld [vmem:[#allocation2 + $0x6a0] ss:$16 sps:$4 sm:$0xff]   ;;  %v3269_v39 = vld [vmem:[#allocation2 + $0x2a8] ss:$16 sps:$4 sm:$0xff]  }
  0x84   :  { %1808 = vmatpush1.bf16.msra.mxu1 %v3185_v41  ;;  %v3277_v41 = vld [vmem:[#allocation2 + $0x2cc] ss:$16 sps:$4 sm:$0xff]  }
  0x85   :  { %1726 = vmatpush1.bf16.msra.mxu0 %v3182_v40  ;;  %1809 = vmatprep.subr.bf16.mxu1 %v3193_v43  ;;  %v3274_v40 = vld [vmem:[#allocation2 + $0x6c4] ss:$16 sps:$4 sm:$0xff]   ;;  %v3275_v43 = vld [vmem:[#allocation2 + $0x2c8] ss:$16 sps:$4 sm:$0xff]  }
  0x86   :  { %1727 = vmatprep.subr.bf16.mxu0 %v3190_v42  ;;  %v3272_v42 = vld [vmem:[#allocation2 + $0x6c0] ss:$16 sps:$4 sm:$0xff]  }
  0x88   :  { %1810 = vmatpush1.bf16.msra.mxu1 %v3191_v45  ;;  %v3283_v45 = vld [vmem:[#allocation2 + $0x2ec] ss:$16 sps:$4 sm:$0xff]  }
  0x89   :  { %1728 = vmatpush1.bf16.msra.mxu0 %v3188_v44  ;;  %1811 = vmatprep.subr.bf16.mxu1 %v3199_v47  ;;  %v3280_v44 = vld [vmem:[#allocation2 + $0x6e4] ss:$16 sps:$4 sm:$0xff]   ;;  %v3281_v47 = vld [vmem:[#allocation2 + $0x2e8] ss:$16 sps:$4 sm:$0xff]  }
  0x8a   :  { %1729 = vmatprep.subr.bf16.mxu0 %v3196_v46  ;;  %v3278_v46 = vld [vmem:[#allocation2 + $0x6e0] ss:$16 sps:$4 sm:$0xff]  }
  0x8c   :  { %1812 = vmatpush1.bf16.msra.mxu1 %v3197_v49  ;;  %v3289_v49 = vld [vmem:[#allocation2 + $0x30c] ss:$16 sps:$4 sm:$0xff]  }
  0x8d   :  { %1730 = vmatpush1.bf16.msra.mxu0 %v3194_v48  ;;  %1813 = vmatprep.subr.bf16.mxu1 %v3205_v51  ;;  %v3286_v48 = vld [vmem:[#allocation2 + $0x704] ss:$16 sps:$4 sm:$0xff]   ;;  %v3287_v51 = vld [vmem:[#allocation2 + $0x308] ss:$16 sps:$4 sm:$0xff]  }
  0x8e   :  { %1731 = vmatprep.subr.bf16.mxu0 %v3202_v50  ;;  %v3284_v50 = vld [vmem:[#allocation2 + $0x700] ss:$16 sps:$4 sm:$0xff]  }
  0x90   :  { %1814 = vmatpush1.bf16.msra.mxu1 %v3203_v54  ;;  %v3295_v54 = vld [vmem:[#allocation2 + $0x32c] ss:$16 sps:$4 sm:$0xff]  }
  0x91   :  { %1732 = vmatpush1.bf16.msra.mxu0 %v3200_v53  ;;  %1815 = vmatprep.subr.bf16.mxu1 %v3211_v56  ;;  %v3292_v53 = vld [vmem:[#allocation2 + $0x724] ss:$16 sps:$4 sm:$0xff]   ;;  %v3293_v56 = vld [vmem:[#allocation2 + $0x328] ss:$16 sps:$4 sm:$0xff]  }
  0x92   :  { %1733 = vmatprep.subr.bf16.mxu0 %v3208_v55  ;;  %v3290_v55 = vld [vmem:[#allocation2 + $0x720] ss:$16 sps:$4 sm:$0xff]  }
  0x94   :  { %1816 = vmatpush1.bf16.msra.mxu1 %v3209_v58  ;;  %v3301_v58 = vld [vmem:[#allocation2 + $0x34c] ss:$16 sps:$4 sm:$0xff]  }
  0x95   :  { %1734 = vmatpush1.bf16.msra.mxu0 %v3206_v57  ;;  %1817 = vmatprep.subr.bf16.mxu1 %v3217_v60  ;;  %v3298_v57 = vld [vmem:[#allocation2 + $0x744] ss:$16 sps:$4 sm:$0xff]   ;;  %v3299_v60 = vld [vmem:[#allocation2 + $0x348] ss:$16 sps:$4 sm:$0xff]  }
  0x96   :  { %1735 = vmatprep.subr.bf16.mxu0 %v3214_v59  ;;  %v3296_v59 = vld [vmem:[#allocation2 + $0x740] ss:$16 sps:$4 sm:$0xff]  }
  0x98   :  { %1818 = vmatpush1.bf16.msra.mxu1 %v3215_v62  ;;  %v3307_v62 = vld [vmem:[#allocation2 + $0x36c] ss:$16 sps:$4 sm:$0xff]  }
  0x99   :  { %1736 = vmatpush1.bf16.msra.mxu0 %v3212_v61  ;;  %1819 = vmatprep.subr.bf16.mxu1 %v3223_v0  ;;  %v3304_v61 = vld [vmem:[#allocation2 + $0x764] ss:$16 sps:$4 sm:$0xff]   ;;  %v3305_v0 = vld [vmem:[#allocation2 + $0x368] ss:$16 sps:$4 sm:$0xff]  }
  0x9a   :  { %1737 = vmatprep.subr.bf16.mxu0 %v3220_v63  ;;  %v3302_v63 = vld [vmem:[#allocation2 + $0x760] ss:$16 sps:$4 sm:$0xff]  }
  0x9c   :  { %1820 = vmatpush1.bf16.msra.mxu1 %v3221_v2  ;;  %v3313_v2 = vld [vmem:[#allocation2 + $0x38c] ss:$16 sps:$4 sm:$0xff]  }
  0x9d   :  { %1738 = vmatpush1.bf16.msra.mxu0 %v3218_v1  ;;  %1821 = vmatprep.subr.bf16.mxu1 %v3229_v4  ;;  %v3310_v1 = vld [vmem:[#allocation2 + $0x784] ss:$16 sps:$4 sm:$0xff]   ;;  %v3311_v4 = vld [vmem:[#allocation2 + $0x388] ss:$16 sps:$4 sm:$0xff]  }
  0x9e   :  { %1739 = vmatprep.subr.bf16.mxu0 %v3226_v3  ;;  %v3308_v3 = vld [vmem:[#allocation2 + $0x780] ss:$16 sps:$4 sm:$0xff]  }
  0xa0   :  { %1822 = vmatpush1.bf16.msra.mxu1 %v3227_v6  ;;  %v3319_v6 = vld [vmem:[#allocation2 + $0x3ac] ss:$16 sps:$4 sm:$0xff]  }
  0xa1   :  { %1740 = vmatpush1.bf16.msra.mxu0 %v3224_v5  ;;  %1823 = vmatprep.subr.bf16.mxu1 %v3235_v9  ;;  %v3316_v5 = vld [vmem:[#allocation2 + $0x7a4] ss:$16 sps:$4 sm:$0xff]   ;;  %v3317_v9 = vld [vmem:[#allocation2 + $0x3a8] ss:$16 sps:$4 sm:$0xff]  }
  0xa2   :  { %1741 = vmatprep.subr.bf16.mxu0 %v3232_v7  ;;  %v3314_v7 = vld [vmem:[#allocation2 + $0x7a0] ss:$16 sps:$4 sm:$0xff]  }
  0xa4   :  { %1824 = vmatpush1.bf16.msra.mxu1 %v3233_v12  ;;  %v3325_v12 = vld [vmem:[#allocation2 + $0x3cc] ss:$16 sps:$4 sm:$0xff]  }
  0xa5   :  { %1742 = vmatpush1.bf16.msra.mxu0 %v3230_v10  ;;  %1834 = vmatprep.subr.bf16.mxu1 %v3241_v15  ;;  %v3322_v10 = vld [vmem:[#allocation2 + $0x7c4] ss:$16 sps:$4 sm:$0xff]  }
  0xa6   :  { %1752 = vmatprep.subr.bf16.mxu0 %v3238_v14  ;;  %v3323_v14 = vld [vmem:[#allocation2 + $0x3c8] ss:$16 sps:$4 sm:$0xff]   ;;  %v3328_v15 = vld [vmem:[#allocation2 + $0x7e4] ss:$16 sps:$4 sm:$0xff]  }
  0xa7   :  { %1826 = vmatmul.mubr.bf16.vlgmr.msra.gmra.mrb[4].mxu1 %v3680_v8  ;;  %v3259_v8 = vld [vmem:[#allocation2 + $0x26c] ss:$16 sps:$4 sm:$0xff]  }
  0xa8   :  { %1744 = vmatmul.mubr.bf16.vlgmr.msra.gmra.mrb[0].mxu0 %v3696_v16  ;;  %1835 = vmatpush1.bf16.msra.mxu1 %v3239_v18  ;;  %v3326_v18 = vld [vmem:[#allocation2 + $0x7e0] ss:$16 sps:$4 sm:$0xff]  }
  0xa9   :  { %1753 = vmatpush1.bf16.msra.mxu0 %v3236_v17  ;;  %1836 = vmatprep.subr.bf16.mxu1 %v3247_v20  ;;  %v3331_v17 = vld [vmem:[#allocation2 + $0x3ec] ss:$16 sps:$4 sm:$0xff]   ;;  %v61_v20 = vld [vmem:[%s3798_s0 + $0x30] sm:$0xff] }
  0xaa   :  { %1754 = vmatprep.subr.bf16.mxu0 %v3244_v19  ;;  %1784 = vmatprep.mubr.bf16.mxu0 %v3703_v24  ;;  %v3329_v19 = vld [vmem:[#allocation2 + $0x3e8] ss:$16 sps:$4 sm:$0xff]  }
  0xab   :  { %1866 = vmatprep.mubr.bf16.mxu1 %v3670_v52  ;;  %v3268_v52 = vld [vmem:[#allocation2 + $0x6a4] ss:$16 sps:$4 sm:$0xff]  }
  0xac   :  { %1837 = vmatpush1.bf16.msra.mxu1 %v3245_v23  ;;  %v3710_v23 = vpack.c.bf16 %v61_v20, %v61_v20  ;;  %v3382_v20 = vld [vmem:[#allocation2 + $0x60c] ss:$16 sps:$4 sm:$0xff]  }
  0xad   :  { %1755 = vmatpush1.bf16.msra.mxu0 %v3242_v22  ;;  %1838 = vmatprep.subr.bf16.mxu1 %v3253_v26  ;;  %v3332_v22 = vld [vmem:[#allocation2 + $0x408] ss:$16 sps:$4 sm:$0xff]  }
  0xae   :  { %1756 = vmatprep.subr.bf16.mxu0 %v3250_v25  ;;  %v3337_v25 = vld [vmem:[#allocation2 + $0x42c] ss:$16 sps:$4 sm:$0xff]   ;;  %v3428_v26 = vld [vmem:[#allocation4] ss:$8 sps:$4 sm:$0xff]  }
  0xb0   :  { %1839 = vmatpush1.bf16.msra.mxu1 %v3251_v28  ;;  %v3335_v28 = vld [vmem:[#allocation2 + $0x428] ss:$16 sps:$4 sm:$0xff]  }
  0xb1   :  { %1757 = vmatpush1.bf16.msra.mxu0 %v3248_v27  ;;  %1840 = vmatprep.subr.bf16.mxu1 %v3259_v8  ;;  %v3430_v27 = vld [vmem:[#allocation4 + $0x4] ss:$8 sps:$4 sm:$0xff]  }
  0xb2   :  { %1758 = vmatprep.subr.bf16.mxu0 %v3256_v29  ;;  %v3433_v29 = vld [vmem:[#allocation4 + $0x14] ss:$8 sps:$4 sm:$0xff]  }
  0xb3   :  { %v3340_v8 = vld [vmem:[#allocation2 + $0x44c] ss:$16 sps:$4 sm:$0xff]  }
  0xb4   :  { %1841 = vmatpush1.bf16.msra.mxu1 %v3257_v31  ;;  %v3436_v31 = vld [vmem:[#allocation4 + $0x24] ss:$8 sps:$4 sm:$0xff]  }
  0xb5   :  { %1759 = vmatpush1.bf16.msra.mxu0 %v3254_v30  ;;  %1842 = vmatprep.subr.bf16.mxu1 %v3265_v33  ;;  %v3431_v30 = vld [vmem:[#allocation4 + $0x10] ss:$8 sps:$4 sm:$0xff]   ;;  %v3343_v33 = vld [vmem:[#allocation2 + $0x46c] ss:$16 sps:$4 sm:$0xff]  }
  0xb6   :  { %1760 = vmatprep.subr.bf16.mxu0 %v3262_v32  ;;  %v3338_v32 = vld [vmem:[#allocation2 + $0x448] ss:$16 sps:$4 sm:$0xff]  }
  0xb8   :  { %1843 = vmatpush1.bf16.msra.mxu1 %v3263_v35  ;;  %v3346_v35 = vld [vmem:[#allocation2 + $0x48c] ss:$16 sps:$4 sm:$0xff]  }
  0xb9   :  { %1761 = vmatpush1.bf16.msra.mxu0 %v3260_v34  ;;  %1844 = vmatprep.subr.bf16.mxu1 %v3271_v37  ;;  %v3341_v34 = vld [vmem:[#allocation2 + $0x468] ss:$16 sps:$4 sm:$0xff]   ;;  %v3442_v37 = vld [vmem:[#allocation4 + $0x44] ss:$8 sps:$4 sm:$0xff]  }
  0xba   :  { %1762 = vmatprep.subr.bf16.mxu0 %v3268_v52  ;;  %v3439_v52 = vld [vmem:[#allocation4 + $0x34] ss:$8 sps:$4 sm:$0xff]  }
  0xbc   :  { %1845 = vmatpush1.bf16.msra.mxu1 %v3269_v39  ;;  %v3349_v39 = vld [vmem:[#allocation2 + $0x4ac] ss:$16 sps:$4 sm:$0xff]  }
  0xbd   :  { %1763 = vmatpush1.bf16.msra.mxu0 %v3266_v38  ;;  %1846 = vmatprep.subr.bf16.mxu1 %v3277_v41  ;;  %v3344_v38 = vld [vmem:[#allocation2 + $0x488] ss:$16 sps:$4 sm:$0xff]   ;;  %v3445_v41 = vld [vmem:[#allocation4 + $0x54] ss:$8 sps:$4 sm:$0xff]  }
  0xbe   :  { %1764 = vmatprep.subr.bf16.mxu0 %v3274_v40  ;;  %v3440_v40 = vld [vmem:[#allocation4 + $0x40] ss:$8 sps:$4 sm:$0xff]  }
  0xc0   :  { %1847 = vmatpush1.bf16.msra.mxu1 %v3275_v43  ;;  %v3352_v43 = vld [vmem:[#allocation2 + $0x4cc] ss:$16 sps:$4 sm:$0xff]  }
  0xc1   :  { %1765 = vmatpush1.bf16.msra.mxu0 %v3272_v42  ;;  %1848 = vmatprep.subr.bf16.mxu1 %v3283_v45  ;;  %v3347_v42 = vld [vmem:[#allocation2 + $0x4a8] ss:$16 sps:$4 sm:$0xff]   ;;  %v3448_v45 = vld [vmem:[#allocation4 + $0x64] ss:$8 sps:$4 sm:$0xff]  }
  0xc2   :  { %1766 = vmatprep.subr.bf16.mxu0 %v3280_v44  ;;  %v3443_v44 = vld [vmem:[#allocation4 + $0x50] ss:$8 sps:$4 sm:$0xff]  }
  0xc4   :  { %1849 = vmatpush1.bf16.msra.mxu1 %v3281_v47  ;;  %v3355_v47 = vld [vmem:[#allocation2 + $0x4ec] ss:$16 sps:$4 sm:$0xff]  }
  0xc5   :  { %1767 = vmatpush1.bf16.msra.mxu0 %v3278_v46  ;;  %1850 = vmatprep.subr.bf16.mxu1 %v3289_v49  ;;  %v3350_v46 = vld [vmem:[#allocation2 + $0x4c8] ss:$16 sps:$4 sm:$0xff]   ;;  %v3451_v49 = vld [vmem:[#allocation4 + $0x74] ss:$8 sps:$4 sm:$0xff]  }
  0xc6   :  { %1768 = vmatprep.subr.bf16.mxu0 %v3286_v48  ;;  %v3446_v48 = vld [vmem:[#allocation4 + $0x60] ss:$8 sps:$4 sm:$0xff]  }
  0xc8   :  { %1851 = vmatpush1.bf16.msra.mxu1 %v3287_v51  ;;  %v3358_v51 = vld [vmem:[#allocation2 + $0x50c] ss:$16 sps:$4 sm:$0xff]  }
  0xc9   :  { %1769 = vmatpush1.bf16.msra.mxu0 %v3284_v50  ;;  %1852 = vmatprep.subr.bf16.mxu1 %v3295_v54  ;;  %v3353_v50 = vld [vmem:[#allocation2 + $0x4e8] ss:$16 sps:$4 sm:$0xff]   ;;  %v3454_v54 = vld [vmem:[#allocation4 + $0x84] ss:$8 sps:$4 sm:$0xff]  }
  0xca   :  { %1770 = vmatprep.subr.bf16.mxu0 %v3292_v53  ;;  %v3449_v53 = vld [vmem:[#allocation4 + $0x70] ss:$8 sps:$4 sm:$0xff]  }
  0xcc   :  { %1853 = vmatpush1.bf16.msra.mxu1 %v3293_v56  ;;  %v3361_v56 = vld [vmem:[#allocation2 + $0x52c] ss:$16 sps:$4 sm:$0xff]  }
  0xcd   :  { %1771 = vmatpush1.bf16.msra.mxu0 %v3290_v55  ;;  %1854 = vmatprep.subr.bf16.mxu1 %v3301_v58  ;;  %v3356_v55 = vld [vmem:[#allocation2 + $0x508] ss:$16 sps:$4 sm:$0xff]   ;;  %v3457_v58 = vld [vmem:[#allocation4 + $0x94] ss:$8 sps:$4 sm:$0xff]  }
  0xce   :  { %1772 = vmatprep.subr.bf16.mxu0 %v3298_v57  ;;  %v3452_v57 = vld [vmem:[#allocation4 + $0x80] ss:$8 sps:$4 sm:$0xff]  }
  0xd0   :  { %1855 = vmatpush1.bf16.msra.mxu1 %v3299_v60  ;;  %v3364_v60 = vld [vmem:[#allocation2 + $0x54c] ss:$16 sps:$4 sm:$0xff]  }
  0xd1   :  { %1773 = vmatpush1.bf16.msra.mxu0 %v3296_v59  ;;  %1856 = vmatprep.subr.bf16.mxu1 %v3307_v62  ;;  %v3359_v59 = vld [vmem:[#allocation2 + $0x528] ss:$16 sps:$4 sm:$0xff]   ;;  %v3460_v62 = vld [vmem:[#allocation4 + $0xa4] ss:$8 sps:$4 sm:$0xff]  }
  0xd2   :  { %1774 = vmatprep.subr.bf16.mxu0 %v3304_v61  ;;  %v3455_v61 = vld [vmem:[#allocation4 + $0x90] ss:$8 sps:$4 sm:$0xff]  }
  0xd4   :  { %1857 = vmatpush1.bf16.msra.mxu1 %v3305_v0  ;;  %v3367_v0 = vld [vmem:[#allocation2 + $0x56c] ss:$16 sps:$4 sm:$0xff]  }
  0xd5   :  { %1775 = vmatpush1.bf16.msra.mxu0 %v3302_v63  ;;  %1858 = vmatprep.subr.bf16.mxu1 %v3313_v2  ;;  %v3362_v63 = vld [vmem:[#allocation2 + $0x548] ss:$16 sps:$4 sm:$0xff]   ;;  %v3463_v2 = vld [vmem:[#allocation4 + $0xb4] ss:$8 sps:$4 sm:$0xff]  }
  0xd6   :  { %1776 = vmatprep.subr.bf16.mxu0 %v3310_v1  ;;  %v3458_v1 = vld [vmem:[#allocation4 + $0xa0] ss:$8 sps:$4 sm:$0xff]  }
  0xd8   :  { %1859 = vmatpush1.bf16.msra.mxu1 %v3311_v4  ;;  %v3370_v4 = vld [vmem:[#allocation2 + $0x58c] ss:$16 sps:$4 sm:$0xff]  }
  0xd9   :  { %1777 = vmatpush1.bf16.msra.mxu0 %v3308_v3  ;;  %1860 = vmatprep.subr.bf16.mxu1 %v3319_v6  ;;  %v3365_v3 = vld [vmem:[#allocation2 + $0x568] ss:$16 sps:$4 sm:$0xff]   ;;  %v3466_v6 = vld [vmem:[#allocation4 + $0xc4] ss:$8 sps:$4 sm:$0xff]  }
  0xda   :  { %1778 = vmatprep.subr.bf16.mxu0 %v3316_v5  ;;  %v3461_v5 = vld [vmem:[#allocation4 + $0xb0] ss:$8 sps:$4 sm:$0xff]  }
  0xdc   :  { %1861 = vmatpush1.bf16.msra.mxu1 %v3317_v9  ;;  %v3373_v9 = vld [vmem:[#allocation2 + $0x5ac] ss:$16 sps:$4 sm:$0xff]  }
  0xdd   :  { %1779 = vmatpush1.bf16.msra.mxu0 %v3314_v7  ;;  %1862 = vmatprep.subr.bf16.mxu1 %v3325_v12  ;;  %v3368_v7 = vld [vmem:[#allocation2 + $0x588] ss:$16 sps:$4 sm:$0xff]   ;;  %v3469_v12 = vld [vmem:[#allocation4 + $0xd4] ss:$8 sps:$4 sm:$0xff]  }
  0xde   :  { %1780 = vmatprep.subr.bf16.mxu0 %v3322_v10  ;;  %v3464_v10 = vld [vmem:[#allocation4 + $0xc0] ss:$8 sps:$4 sm:$0xff]  }
  0xe0   :  { %1863 = vmatpush1.bf16.msra.mxu1 %v3323_v14  ;;  %v3376_v14 = vld [vmem:[#allocation2 + $0x5cc] ss:$16 sps:$4 sm:$0xff]  }
  0xe1   :  { %1781 = vmatpush1.bf16.msra.mxu0 %v3320_v13  ;;  %1864 = vmatprep.subr.bf16.mxu1 %v3331_v17  ;;  %v3371_v13 = vld [vmem:[#allocation2 + $0x5a8] ss:$16 sps:$4 sm:$0xff]  }
  0xe2   :  { %1782 = vmatprep.subr.bf16.mxu0 %v3328_v15  ;;  %v3467_v15 = vld [vmem:[#allocation4 + $0xd0] ss:$8 sps:$4 sm:$0xff]  }
  0xe3   :  { %v3374_v17 = vld [vmem:[#allocation2 + $0x5c8] ss:$16 sps:$4 sm:$0xff]  }
  0xe4   :  { %1865 = vmatpush1.bf16.msra.mxu1 %v3329_v19  ;;  %v3377_v19 = vld [vmem:[#allocation2 + $0x5e8] ss:$16 sps:$4 sm:$0xff]  }
  0xe5   :  { %1783 = vmatpush1.bf16.msra.mxu0 %v3326_v18  ;;  %1875 = vmatprep.subr.bf16.mxu1 %v3334_v21  ;;  %v3379_v18 = vld [vmem:[#allocation2 + $0x5ec] ss:$16 sps:$4 sm:$0xff]   ;;  %v3380_v21 = vld [vmem:[#allocation2 + $0x608] ss:$16 sps:$4 sm:$0xff]  }
  0xe6   :  { %2369 = vmatprep.subr.bf16.mxu0 %v3430_v27  ;;  %v3386_v27 = vld [vmem:[#allocation2 + $0x648] ss:$16 sps:$4 sm:$0xff]  }
  0xe7   :  { %1867 = vmatmul.mubr.bf16.vlgmr.msra.gmra.mrb[4].mxu1 %v3682_v11  ;;  %v3434_v11 = vld [vmem:[#allocation4 + $0x20] ss:$8 sps:$4 sm:$0xff]  }
  0xe8   :  { %1785 = vmatmul.mubr.bf16.vlgmr.msra.gmra.mrb[0].mxu0 %v3710_v23  ;;  %1876 = vmatpush1.bf16.msra.mxu1 %v3332_v22  ;;  %v3385_v22 = vld [vmem:[#allocation2 + $0x62c] ss:$16 sps:$4 sm:$0xff]  }
  0xe9   :  { %1907 = vmatprep.mubr.bf16.mxu1 %v3690_v36  ;;  %1877 = vmatprep.subr.bf16.mxu1 %v3337_v25  ;;  %v3437_v36 = vld [vmem:[#allocation4 + $0x30] ss:$8 sps:$4 sm:$0xff]  }
  0xea   :  { %2370 = vmatpush1.bf16.msra.mxu0 %v3428_v26  ;;  %v3383_v25 = vld [vmem:[#allocation2 + $0x628] ss:$16 sps:$4 sm:$0xff]   ;;  %v3388_v26 = vld [vmem:[#allocation2 + $0x64c] ss:$16 sps:$4 sm:$0xff]  }
  0xeb   :  { %2371 = vmatprep.subr.bf16.mxu0 %v3433_v29  ;;  %v3389_v29 = vld [vmem:[#allocation2 + $0x668] ss:$16 sps:$4 sm:$0xff]  }
  0xec   :  { %1878 = vmatpush1.bf16.msra.mxu1 %v3335_v28  ;;  %v3391_v28 = vld [vmem:[#allocation2 + $0x66c] ss:$16 sps:$4 sm:$0xff]  }
  0xed   :  { %1879 = vmatprep.subr.bf16.mxu1 %v3340_v8  ;;  %v3394_v8 = vld [vmem:[#allocation2 + $0x68c] ss:$16 sps:$4 sm:$0xff]  }
  0xee   :  { %2372 = vmatpush1.bf16.msra.mxu0 %v3431_v30  ;;  %v3392_v30 = vld [vmem:[#allocation2 + $0x688] ss:$16 sps:$4 sm:$0xff]  }
  0xef   :  { %2373 = vmatprep.subr.bf16.mxu0 %v3436_v31  ;;  %v3397_v31 = vld [vmem:[#allocation2 + $0x6ac] ss:$16 sps:$4 sm:$0xff]  }
  0xf0   :  { %1880 = vmatpush1.bf16.msra.mxu1 %v3338_v32  ;;  %v3400_v32 = vld [vmem:[#allocation2 + $0x6cc] ss:$16 sps:$4 sm:$0xff]  }
  0xf1   :  { %1881 = vmatprep.subr.bf16.mxu1 %v3343_v33 }
  0xf2   :  { %2374 = vmatpush1.bf16.msra.mxu0 %v3434_v11 }
  0xf3   :  { %2375 = vmatprep.subr.bf16.mxu0 %v3439_v52  ;;  %v3398_v52 = vld [vmem:[#allocation2 + $0x6c8] ss:$16 sps:$4 sm:$0xff]  }
  0xf4   :  { %1882 = vmatpush1.bf16.msra.mxu1 %v3341_v34  ;;  %v3470_v34 = vld [vmem:[#allocation4 + $0xe0] ss:$8 sps:$4 sm:$0xff]  }
  0xf5   :  { %1883 = vmatprep.subr.bf16.mxu1 %v3346_v35 }
  0xf6   :  { %2376 = vmatpush1.bf16.msra.mxu0 %v3437_v36 }
  0xf7   :  { %2377 = vmatprep.subr.bf16.mxu0 %v3442_v37  ;;  %v3403_v37 = vld [vmem:[#allocation2 + $0x6ec] ss:$16 sps:$4 sm:$0xff]  }
  0xf8   :  { %1884 = vmatpush1.bf16.msra.mxu1 %v3344_v38  ;;  %v3475_v38 = vld [vmem:[#allocation4 + $0xf4] ss:$8 sps:$4 sm:$0xff]  }
  0xf9   :  { %1885 = vmatprep.subr.bf16.mxu1 %v3349_v39  ;;  %v3473_v39 = vld [vmem:[#allocation4 + $0xf0] ss:$8 sps:$4 sm:$0xff]  }
  0xfa   :  { %2378 = vmatpush1.bf16.msra.mxu0 %v3440_v40  ;;  %v3401_v40 = vld [vmem:[#allocation2 + $0x6e8] ss:$16 sps:$4 sm:$0xff]  }
  0xfb   :  { %2379 = vmatprep.subr.bf16.mxu0 %v3445_v41  ;;  %v3406_v41 = vld [vmem:[#allocation2 + $0x70c] ss:$16 sps:$4 sm:$0xff]  }
  0xfc   :  { %1886 = vmatpush1.bf16.msra.mxu1 %v3347_v42  ;;  %v3404_v42 = vld [vmem:[#allocation2 + $0x708] ss:$16 sps:$4 sm:$0xff]  }
  0xfd   :  { %1887 = vmatprep.subr.bf16.mxu1 %v3352_v43  ;;  %v3478_v43 = vld [vmem:[#allocation4 + $0x104] ss:$8 sps:$4 sm:$0xff]  }
  0xfe   :  { %2380 = vmatpush1.bf16.msra.mxu0 %v3443_v44  ;;  %v3409_v44 = vld [vmem:[#allocation2 + $0x72c] ss:$16 sps:$4 sm:$0xff]  }
  0xff   :  { %2381 = vmatprep.subr.bf16.mxu0 %v3448_v45  ;;  %v3407_v45 = vld [vmem:[#allocation2 + $0x728] ss:$16 sps:$4 sm:$0xff]  }
 0x100   :  { %1888 = vmatpush1.bf16.msra.mxu1 %v3350_v46  ;;  %v3412_v46 = vld [vmem:[#allocation2 + $0x74c] ss:$16 sps:$4 sm:$0xff]  }
 0x101   :  { %1889 = vmatprep.subr.bf16.mxu1 %v3355_v47  ;;  %v3410_v47 = vld [vmem:[#allocation2 + $0x748] ss:$16 sps:$4 sm:$0xff]  }
 0x102   :  { %2382 = vmatpush1.bf16.msra.mxu0 %v3446_v48  ;;  %v3415_v48 = vld [vmem:[#allocation2 + $0x76c] ss:$16 sps:$4 sm:$0xff]  }
 0x103   :  { %2383 = vmatprep.subr.bf16.mxu0 %v3451_v49  ;;  %v3413_v49 = vld [vmem:[#allocation2 + $0x768] ss:$16 sps:$4 sm:$0xff]  }
 0x104   :  { %1890 = vmatpush1.bf16.msra.mxu1 %v3353_v50  ;;  %v3418_v50 = vld [vmem:[#allocation2 + $0x78c] ss:$16 sps:$4 sm:$0xff]  }
 0x105   :  { %1891 = vmatprep.subr.bf16.mxu1 %v3358_v51  ;;  %v3416_v51 = vld [vmem:[#allocation2 + $0x788] ss:$16 sps:$4 sm:$0xff]  }
 0x106   :  { %2384 = vmatpush1.bf16.msra.mxu0 %v3449_v53  ;;  %v3421_v53 = vld [vmem:[#allocation2 + $0x7ac] ss:$16 sps:$4 sm:$0xff]  }
 0x107   :  { %2385 = vmatprep.subr.bf16.mxu0 %v3454_v54  ;;  %v3419_v54 = vld [vmem:[#allocation2 + $0x7a8] ss:$16 sps:$4 sm:$0xff]  }
 0x108   :  { %1892 = vmatpush1.bf16.msra.mxu1 %v3356_v55  ;;  %v3424_v55 = vld [vmem:[#allocation2 + $0x7cc] ss:$16 sps:$4 sm:$0xff]  }
 0x109   :  { %1893 = vmatprep.subr.bf16.mxu1 %v3361_v56  ;;  %v3422_v56 = vld [vmem:[#allocation2 + $0x7c8] ss:$16 sps:$4 sm:$0xff]  }
 0x10a   :  { %2386 = vmatpush1.bf16.msra.mxu0 %v3452_v57  ;;  %v3427_v57 = vld [vmem:[#allocation2 + $0x7ec] ss:$16 sps:$4 sm:$0xff]  }
 0x10b   :  { %2387 = vmatprep.subr.bf16.mxu0 %v3457_v58  ;;  %v3425_v58 = vld [vmem:[#allocation2 + $0x7e8] ss:$16 sps:$4 sm:$0xff]  }
 0x10c   :  { %1894 = vmatpush1.bf16.msra.mxu1 %v3359_v59  ;;  %v329_v59 = vlaneseq }
 0x10d   :  { %1895 = vmatprep.subr.bf16.mxu1 %v3364_v60 }
 0x10e   :  { %2388 = vmatpush1.bf16.msra.mxu0 %v3455_v61  ;;  %v3718_v60 = vshrl.u32 %v329_v59, 7 }
 0x10f   :  { %2389 = vmatprep.subr.bf16.mxu0 %v3460_v62  ;;  %v3724_v62 = vld [vmem:[%s3800_s2] sm:$0xf] }
 0x110   :  { %1896 = vmatpush1.bf16.msra.mxu1 %v3362_v63  ;;  %v331_v61 = vsub.s32 0, %v3718_v60  ;;  %v335_v63 = vsub.s32 1, %v3718_v60  ;;  %v339_v59 = vsub.s32 2, %v3718_v60 }
 0x111   :  { %1897 = vmatprep.subr.bf16.mxu1 %v3367_v0 }
 0x112   :  { %2390 = vmatpush1.bf16.msra.mxu0 %v3458_v1  ;;  %v332_v0 = vrot.slane %v3724_v62, %v331_v61 }
 0x113   :  { %2391 = vmatprep.subr.bf16.mxu0 %v3463_v2 }
 0x114   :  { %1898 = vmatpush1.bf16.msra.mxu1 %v3365_v3 }
 0x115   :  { %1899 = vmatprep.subr.bf16.mxu1 %v3370_v4 }
 0x116   :  { %2392 = vmatpush1.bf16.msra.mxu0 %v3461_v5 }
 0x117   :  { %2393 = vmatprep.subr.bf16.mxu0 %v3466_v6 }
 0x118   :  { %1900 = vmatpush1.bf16.msra.mxu1 %v3368_v7 }
 0x119   :  { %1901 = vmatprep.subr.bf16.mxu1 %v3373_v9 }
 0x11a   :  { %2394 = vmatpush1.bf16.msra.mxu0 %v3464_v10 }
 0x11b   :  { %2395 = vmatprep.subr.bf16.mxu0 %v3469_v12 }
 0x11c   :  { %1902 = vmatpush1.bf16.msra.mxu1 %v3371_v13 }
 0x11d   :  { %1903 = vmatprep.subr.bf16.mxu1 %v3376_v14 }
 0x11e   :  { %2396 = vmatpush1.bf16.msra.mxu0 %v3467_v15 }
 0x120   :  { %1904 = vmatpush1.bf16.msra.mxu1 %v3374_v17  ;;  %v3476_v17 = vld [vmem:[#allocation4 + $0x100] ss:$8 sps:$4 sm:$0xff]  }
 0x121   :  { %1905 = vmatprep.subr.bf16.mxu1 %v3379_v18 }
 0x124   :  { %1906 = vmatpush1.bf16.msra.mxu1 %v3377_v19  ;;  %v3481_v19 = vld [vmem:[#allocation4 + $0x114] ss:$8 sps:$4 sm:$0xff]  }
 0x125   :  { %1916 = vmatprep.subr.bf16.mxu1 %v3382_v20  ;;  %v3524_v20 = vld [vmem:[%s3803_s5 + $0x40] sm:$0xff]  }
 0x127   :  { %1908 = vmatmul.mubr.bf16.vlgmr.msra.gmra.mrb[4].mxu1 %v3696_v16  ;;  %v3395_v16 = vld [vmem:[#allocation2 + $0x6a8] ss:$16 sps:$4 sm:$0xff]  }
 0x128   :  { %1917 = vmatpush1.bf16.msra.mxu1 %v3380_v21  ;;  %1948 = vmatprep.mubr.bf16.mxu1 %v3703_v24  ;;  %v3472_v24 = vld [vmem:[#allocation4 + $0xe4] ss:$8 sps:$4 sm:$0xff]  }
 0x129   :  { %1918 = vmatprep.subr.bf16.mxu1 %v3385_v22  ;;  %2397 = vmatprep.subr.bf16.mxu0 %v3472_v24  ;;  %v3525_v21 = vld [vmem:[%s3803_s5] sm:$0xff]   ;;  %v3526_v22 = vld [vmem:[%s3803_s5 + $0x48] sm:$0xff]  }
 0x12a   :  { %2398 = vmatpush1.bf16.msra.mxu0 %v3470_v34  ;;  %v3532_v24 = vld [vmem:[%s3803_s5 + $0x60] sm:$0xff]   ;;  %v3493_v34 = vld [vmem:[#allocation4 + $0x154] ss:$8 sps:$4 sm:$0xff]  }
 0x12b   :  { %2399 = vmatprep.subr.bf16.mxu0 %v3475_v38  ;;  %v3535_v38 = vld [vmem:[%s3803_s5 + $0x28] sm:$0xff]  }
 0x12c   :  { %1919 = vmatpush1.bf16.msra.mxu1 %v3383_v25  ;;  %v3479_v25 = vld [vmem:[#allocation4 + $0x110] ss:$8 sps:$4 sm:$0xff]  }
 0x12d   :  { %1920 = vmatprep.subr.bf16.mxu1 %v3388_v26  ;;  %v3484_v26 = vld [vmem:[#allocation4 + $0x124] ss:$8 sps:$4 sm:$0xff]  }
 0x12e   :  { %2400 = vmatpush1.bf16.msra.mxu0 %v3473_v39  ;;  %v3494_v39 = vld [vmem:[#allocation4 + $0x160] ss:$8 sps:$4 sm:$0xff]  }
 0x12f   :  { %2410 = vmatprep.subr.bf16.mxu0 %v3478_v43  ;;  %v3500_v43 = vld [vmem:[#allocation4 + $0x180] ss:$8 sps:$4 sm:$0xff]  }
 0x130   :  { %1921 = vmatpush1.bf16.msra.mxu1 %v3386_v27  ;;  %v3527_v27 = vld [vmem:[%s3803_s5 + $0x8] sm:$0xff]  }
 0x131   :  { %1922 = vmatprep.subr.bf16.mxu1 %v3391_v28  ;;  %v3528_v28 = vld [vmem:[%s3803_s5 + $0x50] sm:$0xff]  }
 0x134   :  { %1923 = vmatpush1.bf16.msra.mxu1 %v3389_v29  ;;  %v3482_v29 = vld [vmem:[#allocation4 + $0x120] ss:$8 sps:$4 sm:$0xff]  }
 0x135   :  { %1924 = vmatprep.subr.bf16.mxu1 %v3394_v8  ;;  %v3487_v8 = vld [vmem:[#allocation4 + $0x134] ss:$8 sps:$4 sm:$0xff]  }
 0x138   :  { %1925 = vmatpush1.bf16.msra.mxu1 %v3392_v30  ;;  %v3529_v30 = vld [vmem:[%s3803_s5 + $0x10] sm:$0xff]  }
 0x139   :  { %1926 = vmatprep.subr.bf16.mxu1 %v3397_v31  ;;  %v3530_v31 = vld [vmem:[%s3803_s5 + $0x58] sm:$0xff]  }
 0x13a   :  { %v1663_v33 = vpop.f32.mrb[0].mxu1 }
 0x13b   :  { %v1665_v11 = vpop.f32.mrb[1].mxu1  ;;  %v1664_v1 = vadd.f32 %v1663_v33, %v332_v0  ;;  %v3531_v33 = vld [vmem:[%s3803_s5 + $0x18] sm:$0xff]   ;;  %v343_v0 = vsub.s32 3, %v3718_v60  ;;  %v2967_v60 = vld [vmem:[%s3804_s6] ss:$0 sm:$0xff] }
 0x13c   :  { %v1667_v35 = vpop.f32.mrb[2].mxu1  ;;  %1927 = vmatpush1.bf16.msra.mxu1 %v3395_v16  ;;  %v3485_v16 = vld [vmem:[#allocation4 + $0x130] ss:$8 sps:$4 sm:$0xff]  }
 0x13d   :  { %v1668_v36 = vpop.f32.mrb[3].mxu1  ;;  %1928 = vmatprep.subr.bf16.mxu1 %v3400_v32  ;;  %v3490_v32 = vld [vmem:[#allocation4 + $0x144] ss:$8 sps:$4 sm:$0xff]  }
 0x13e   :  { %v3533_v35 = vld [vmem:[%s3803_s5 + $0x20] sm:$0xff]   ;;  %v3491_v36 = vld [vmem:[#allocation4 + $0x150] ss:$8 sps:$4 sm:$0xff]  }
 0x140   :  { %1929 = vmatpush1.bf16.msra.mxu1 %v3398_v52  ;;  %v3534_v52 = vld [vmem:[%s3803_s5 + $0x68] sm:$0xff]  }
 0x141   :  { %1930 = vmatprep.subr.bf16.mxu1 %v3403_v37  ;;  %v3496_v37 = vld [vmem:[#allocation4 + $0x164] ss:$8 sps:$4 sm:$0xff]  }
 0x144   :  { %1931 = vmatpush1.bf16.msra.mxu1 %v3401_v40  ;;  %v3499_v40 = vld [vmem:[#allocation4 + $0x174] ss:$8 sps:$4 sm:$0xff]  }
 0x145   :  { %1932 = vmatprep.subr.bf16.mxu1 %v3406_v41  ;;  %v3497_v41 = vld [vmem:[#allocation4 + $0x170] ss:$8 sps:$4 sm:$0xff]  }
 0x148   :  { %1933 = vmatpush1.bf16.msra.mxu1 %v3404_v42  ;;  %v3502_v42 = vld [vmem:[#allocation4 + $0x184] ss:$8 sps:$4 sm:$0xff]  }
 0x149   :  { %1934 = vmatprep.subr.bf16.mxu1 %v3409_v44  ;;  %v3505_v44 = vld [vmem:[#allocation4 + $0x194] ss:$8 sps:$4 sm:$0xff]  }
 0x14c   :  { %1935 = vmatpush1.bf16.msra.mxu1 %v3407_v45  ;;  %v3503_v45 = vld [vmem:[#allocation4 + $0x190] ss:$8 sps:$4 sm:$0xff]  }
 0x14d   :  { %1936 = vmatprep.subr.bf16.mxu1 %v3412_v46  ;;  %v3508_v46 = vld [vmem:[#allocation4 + $0x1a4] ss:$8 sps:$4 sm:$0xff]  }
 0x150   :  { %1937 = vmatpush1.bf16.msra.mxu1 %v3410_v47  ;;  %v3506_v47 = vld [vmem:[#allocation4 + $0x1a0] ss:$8 sps:$4 sm:$0xff]  }
 0x151   :  { %1938 = vmatprep.subr.bf16.mxu1 %v3415_v48  ;;  %v3511_v48 = vld [vmem:[#allocation4 + $0x1b4] ss:$8 sps:$4 sm:$0xff]  }
 0x154   :  { %1939 = vmatpush1.bf16.msra.mxu1 %v3413_v49  ;;  %v3509_v49 = vld [vmem:[#allocation4 + $0x1b0] ss:$8 sps:$4 sm:$0xff]  }
 0x155   :  { %1940 = vmatprep.subr.bf16.mxu1 %v3418_v50  ;;  %v3514_v50 = vld [vmem:[#allocation4 + $0x1c4] ss:$8 sps:$4 sm:$0xff]  }
 0x158   :  { %1941 = vmatpush1.bf16.msra.mxu1 %v3416_v51  ;;  %v3512_v51 = vld [vmem:[#allocation4 + $0x1c0] ss:$8 sps:$4 sm:$0xff]  }
 0x159   :  { %1942 = vmatprep.subr.bf16.mxu1 %v3421_v53  ;;  %v3517_v53 = vld [vmem:[#allocation4 + $0x1d4] ss:$8 sps:$4 sm:$0xff]  }
 0x15c   :  { %1943 = vmatpush1.bf16.msra.mxu1 %v3419_v54  ;;  %v3515_v54 = vld [vmem:[#allocation4 + $0x1d0] ss:$8 sps:$4 sm:$0xff]  }
 0x15d   :  { %1944 = vmatprep.subr.bf16.mxu1 %v3424_v55  ;;  %v3520_v55 = vld [vmem:[#allocation4 + $0x1e4] ss:$8 sps:$4 sm:$0xff]  }
 0x160   :  { %1945 = vmatpush1.bf16.msra.mxu1 %v3422_v56  ;;  %v3518_v56 = vld [vmem:[#allocation4 + $0x1e0] ss:$8 sps:$4 sm:$0xff]  }
 0x161   :  { %1946 = vmatprep.subr.bf16.mxu1 %v3427_v57  ;;  %v3523_v57 = vld [vmem:[#allocation4 + $0x1f4] ss:$8 sps:$4 sm:$0xff]  }
 0x164   :  { %1947 = vmatpush1.bf16.msra.mxu1 %v3425_v58  ;;  %v3521_v58 = vld [vmem:[#allocation4 + $0x1f0] ss:$8 sps:$4 sm:$0xff]  }
 0x165   :  { %2984 = vmatprep.subr.bf16.mxu1 %v3524_v20  ;;  %v2037_v20 = vld [vmem:[%s3802_s4] sm:$0x3] }
 0x167   :  { %1949 = vmatmul.mubr.bf16.vlgmr.msra.gmra.mrb[4].mxu1 %v3710_v23  ;;  %v336_v23 = vrot.slane %v3724_v62, %v335_v63 }
 0x168   :  { %2985 = vmatpush3.bf16.msra.mxu1 %v3525_v21  ;;  %v2042_v21 = vrot.slane %v2037_v20, %v331_v61 }
 0x169   :  { %v1666_v2 = vadd.f32 %v1665_v11, %v336_v23  ;;  %2986 = vmatprep.subr.bf16.mxu1 %v3526_v22  ;;  %v3488_v11 = vld [vmem:[#allocation4 + $0x140] ss:$8 sps:$4 sm:$0xff]   ;;  %v340_v23 = vrot.slane %v3724_v62, %v339_v59  ;;  %v2046_v22 = vrot.slane %v2037_v20, %v335_v63 }
 0x16c   :  { %2987 = vmatpush3.bf16.msra.mxu1 %v3527_v27 }
 0x16d   :  { %2988 = vmatprep.subr.bf16.mxu1 %v3528_v28 }
 0x170   :  { %2989 = vmatpush3.bf16.msra.mxu1 %v3529_v30 }
 0x171   :  { %2990 = vmatprep.subr.bf16.mxu1 %v3530_v31 }
 0x174   :  { %2991 = vmatpush3.bf16.msra.mxu1 %v3531_v33 }
 0x175   :  { %2992 = vmatprep.subr.bf16.mxu1 %v3532_v24 }
 0x178   :  { %2993 = vmatpush3.bf16.msra.mxu1 %v3533_v35 }
 0x179   :  { %2994 = vmatprep.subr.bf16.mxu1 %v3534_v52 }
 0x17c   :  { %2995 = vmatpush3.bf16.msra.mxu1 %v3535_v38 }
 0x1bb   :  { %v1786_v3 = vpop.f32.mrb[0].mxu0 }
 0x1bc   :  { %v3007_v4 = vadd.f32 %v1786_v3, %v1664_v1  ;;  %v1788_v5 = vpop.f32.mrb[1].mxu0  ;;  %v344_v1 = vrot.slane %v3724_v62, %v343_v0  ;;  %v3536_v62 = vld [vmem:[%s3803_s5 + $0x70] sm:$0xff]  }
 0x1bd   :  { %v3009_v6 = vadd.f32 %v1788_v5, %v1666_v2  ;;  %v1790_v7 = vpop.f32.mrb[2].mxu0  ;;  %2996 = vmatprep.subr.bf16.mxu1 %v3536_v62 }
 0x1be   :  { %vm1957_vm0 = vcmp.gt.f32.partialorder %v3007_v4, 0.0  ;;  %v1961_v9 = vmul.f32 0.2, %v3007_v4  ;;  %v1791_v10 = vpop.f32.mrb[3].mxu0 }
 0x1bf   :  { %vm1958_vm1 = vcmp.gt.f32.partialorder %v3009_v6, 0.0  ;;  %v1962_v12 = vmul.f32 0.2, %v3009_v6 }
 0x1c0   :  { %v1965_v13 = vsel %vm1957_vm0, %v3007_v4, %v1961_v9 }
 0x1c1   :  { %v1966_v14 = vsel %vm1958_vm1, %v3009_v6, %v1962_v12  ;;  %v1969_v18 = vpack.c.bf16 %v1965_v13, %v1965_v13 }
 0x1c2   :  { %v1970_v15 = vpack.c.bf16 %v1966_v14, %v1966_v14 }
 0x1c4   :  { %2401 = vmatprep.mubr.bf16.mxu0 %v1970_v15 }
 0x1c5   :  { %2402 = vmatmul.mubr.bf16.vlgmr.msra.gmra.mrb[4].mxu0 %v1969_v18  ;;  %v3538_v18 = vld [vmem:[%s3803_s5 + $0x78] sm:$0xff]  }
 0x1c6   :  { %2411 = vmatpush1.bf16.msra.mxu0 %v3476_v17  ;;  %v3537_v17 = vld [vmem:[%s3803_s5 + $0x30] sm:$0xff]  }
 0x1c7   :  { %2412 = vmatprep.subr.bf16.mxu0 %v3481_v19  ;;  %2997 = vmatpush3.bf16.msra.mxu1 %v3537_v17  ;;  %v3539_v19 = vld [vmem:[%s3803_s5 + $0x38] sm:$0xff]  }
 0x1c8   :  { %2998 = vmatprep.subr.bf16.mxu1 %v3538_v18 }
 0x1ca   :  { %2413 = vmatpush1.bf16.msra.mxu0 %v3479_v25 }
 0x1cb   :  { %2414 = vmatprep.subr.bf16.mxu0 %v3484_v26  ;;  %2999 = vmatpush3.bf16.msra.mxu1 %v3539_v19 }
 0x1ce   :  { %2415 = vmatpush1.bf16.msra.mxu0 %v3482_v29 }
 0x1cf   :  { %2416 = vmatprep.subr.bf16.mxu0 %v3487_v8 }
 0x1d2   :  { %2417 = vmatpush1.bf16.msra.mxu0 %v3485_v16 }
 0x1d3   :  { %2418 = vmatprep.subr.bf16.mxu0 %v3490_v32 }
 0x1d6   :  { %2419 = vmatpush1.bf16.msra.mxu0 %v3488_v11 }
 0x1d7   :  { %2420 = vmatprep.subr.bf16.mxu0 %v3493_v34 }
 0x1da   :  { %2421 = vmatpush1.bf16.msra.mxu0 %v3491_v36 }
 0x1db   :  { %2422 = vmatprep.subr.bf16.mxu0 %v3496_v37 }
 0x1de   :  { %2423 = vmatpush1.bf16.msra.mxu0 %v3494_v39 }
 0x1df   :  { %2424 = vmatprep.subr.bf16.mxu0 %v3499_v40 }
 0x1e2   :  { %2425 = vmatpush1.bf16.msra.mxu0 %v3497_v41 }
 0x1e3   :  { %2426 = vmatprep.subr.bf16.mxu0 %v3502_v42 }
 0x1e6   :  { %2427 = vmatpush1.bf16.msra.mxu0 %v3500_v43 }
 0x1e7   :  { %2428 = vmatprep.subr.bf16.mxu0 %v3505_v44 }
 0x1ea   :  { %2429 = vmatpush1.bf16.msra.mxu0 %v3503_v45 }
 0x1eb   :  { %2430 = vmatprep.subr.bf16.mxu0 %v3508_v46 }
 0x1ee   :  { %2431 = vmatpush1.bf16.msra.mxu0 %v3506_v47 }
 0x1ef   :  { %2432 = vmatprep.subr.bf16.mxu0 %v3511_v48 }
 0x1f2   :  { %2433 = vmatpush1.bf16.msra.mxu0 %v3509_v49 }
 0x1f3   :  { %2434 = vmatprep.subr.bf16.mxu0 %v3514_v50 }
 0x1f6   :  { %2435 = vmatpush1.bf16.msra.mxu0 %v3512_v51 }
 0x1f7   :  { %2436 = vmatprep.subr.bf16.mxu0 %v3517_v53 }
 0x1fa   :  { %2437 = vmatpush1.bf16.msra.mxu0 %v3515_v54 }
 0x1fb   :  { %2438 = vmatprep.subr.bf16.mxu0 %v3520_v55 }
 0x1fe   :  { %2439 = vmatpush1.bf16.msra.mxu0 %v3518_v56 }
 0x1ff   :  { %2440 = vmatprep.subr.bf16.mxu0 %v3523_v57 }
 0x202   :  { %2441 = vmatpush1.bf16.msra.mxu0 %v3521_v58 }
 0x23a   :  { %v1950_v2 = vpop.f32.mrb[4].mxu1 }
 0x23b   :  { %v3010_v3 = vadd.f32 %v1950_v2, %v340_v23  ;;  %v1952_v4 = vpop.f32.mrb[5].mxu1 }
 0x23c   :  { %v3011_v5 = vadd.f32 %v1952_v4, %v344_v1  ;;  %v1954_v6 = vpop.f32.mrb[6].mxu1 }
 0x23d   :  { %vm1959_vm2 = vcmp.gt.f32.partialorder %v3010_v3, 0.0  ;;  %v1963_v7 = vmul.f32 0.2, %v3010_v3  ;;  %v1955_v9 = vpop.f32.mrb[7].mxu1 }
 0x23e   :  { %vm1960_vm3 = vcmp.gt.f32.partialorder %v3011_v5, 0.0  ;;  %v1964_v10 = vmul.f32 0.2, %v3011_v5 }
 0x23f   :  { %v1967_v12 = vsel %vm1959_vm2, %v3010_v3, %v1963_v7 }
 0x240   :  { %v1968_v13 = vsel %vm1960_vm3, %v3011_v5, %v1964_v10  ;;  %v1971_v15 = vpack.c.bf16 %v1967_v12, %v1967_v12 }
 0x241   :  { %v1972_v14 = vpack.c.bf16 %v1968_v13, %v1968_v13 }
 0x243   :  { %2442 = vmatprep.mubr.bf16.mxu0 %v1972_v14 }
 0x244   :  { %2443 = vmatmul.mubr.bf16.vlgmr.msra.gmra.mrb[4].mxu0 %v1971_v15 }
 0x317   :  { %v2444_v25 = vpop.f32.mrb[4].mxu0 }
 0x318   :  { %v3012_v26 = vadd.f32 %v2444_v25, %v2042_v21  ;;  %v2446_v27 = vpop.f32.mrb[5].mxu0 }
 0x319   :  { %v3013_v28 = vadd.f32 %v2446_v27, %v2046_v22  ;;  %v2448_v29 = vpop.f32.mrb[6].mxu0 }
 0x31a   :  { %vm2451_vm4 = vcmp.gt.f32.partialorder %v3012_v26, 0.0  ;;  %v2453_v8 = vmul.f32 0.2, %v3012_v26  ;;  %v2449_v30 = vpop.f32.mrb[7].mxu0 }
 0x31b   :  { %vm2452_vm5 = vcmp.gt.f32.partialorder %v3013_v28, 0.0  ;;  %v2454_v31 = vmul.f32 0.2, %v3013_v28 }
 0x31c   :  { %v2455_v16 = vsel %vm2451_vm4, %v3012_v26, %v2453_v8 }
 0x31d   :  { %v2456_v32 = vsel %vm2452_vm5, %v3013_v28, %v2454_v31  ;;  %v2457_v24 = vpack.c.bf16 %v2455_v16, %v2455_v16 }
 0x31e   :  { %v2458_v33 = vpack.c.bf16 %v2456_v32, %v2456_v32 }
 0x320   :  { %2626 = vmatprep.mubr.bf16.mxu1 %v2458_v33 }
 0x321   :  { %2627 = vmatmul.mubr.bf16.vlgmr.msra.gmra.mrb[8].mxu1 %v2457_v24 }
 0x3f4   :  { %v3000_v61 = vpop.f32.mrb[8].mxu1 }
 0x3f5   :  { %v3001_v63 = vpop.f32.mrb[9].mxu1 }
 0x3f6   :  { %v3002_v11 = vadd.f32 %v3001_v63, %v3000_v61  ;;  %v3003_v34 = vpop.f32.mrb[10].mxu1 }
 0x3f7   :  { %v3004_v35 = vpop.f32.mrb[11].mxu1 }
 0x3f8   :  { %v2629_v52 = vadd.f32 %v3002_v11, %v2967_v60 }
 0x3fa   :  { %v2634_v36 = vsub.f32 0.0, %v2629_v52 }
 0x3fc   :  { %v2635_v37 = vmul.f32 1.442695, %v2634_v36 }
 0x3fe   :  { %3540 = vpow2.f32 %v2635_v37 }
 0x408   :  { %v3541_v38 = vpop.eup %3540 }
 0x409   :  { %v2637_v39 = vadd.f32 1.0, %v3541_v38 }
 0x40b   :  { %3542 = vrcp.f32 %v2637_v39 }
 0x415   :  { %v3543_v40 = vpop.eup %3542 }
 0x416   :  { %v2639_v41 = vpack.c.bf16 %v3543_v40, %v3543_v40 }
 0x418   :  { %2640 = vst [vmem:[%s3805_s7] sm:$0xf] %v2639_v41 }
 0x419   :  { %2645 = vsyncpa [#allocation3], 1 }
 0x41a   :  { %2646 = vsyncpa [#allocation5], 1 }

</bundles_post_ra>
